<compile_context>
chip_gen: v6e
topology: v6e:2x2x1
jax: 0.10.0
libtpu: 0.0.40
codegen_flags: <defaults>
</compile_context>

<pallas_src>
import functools

import jax
import jax.numpy as jnp
import numpy as np
from jax.experimental import pallas as pl
from jax.experimental.pallas import tpu as pltpu


# ----------------------------- Pallas kernel --------------------------------

def _fused_lstm_kernel(x_ref, *refs, num_layers, hidden, batch, t_block):
    """All LSTM layers over one time block of the sequence.

    x_ref  : (T_BLK*B, E)  bf16 flattened time-major inputs for this block
    per layer l (3 refs each):
        wih  : (E_l, 4H)   bf16  W_ih^T
        whh  : (H, 4H)     bf16  W_hh^T
        bias : (1, 4H)     f32   b_ih + b_hh
    y_ref  : (T_BLK*B, H)  f32  last layer's hidden states for this block
    hn_ref : (L, B, H)     f32  final hidden state (written on last block)
    cn_ref : (L, B, H)     f32  final cell state   (written on last block)
    h_scr  : (L, B, H)     bf16 VMEM scratch, carried across grid steps
    c_scr  : (L, B, H)     f32  VMEM scratch, carried across grid steps
    """
    w_refs = refs[:3 * num_layers]
    y_ref, hn_ref, cn_ref = refs[3 * num_layers:3 * num_layers + 3]
    h_scr, c_scr = refs[3 * num_layers + 3:]

    H = hidden
    tb = pl.program_id(0)
    last_tb = pl.num_programs(0) - 1

    @pl.when(tb == 0)
    def _init():
        h_scr[...] = jnp.zeros_like(h_scr)
        c_scr[...] = jnp.zeros_like(c_scr)
        # Robustness: hn/cn blocks are revisited every grid step; make every
        # writeback defined even before the last block overwrites them.
        hn_ref[...] = jnp.zeros_like(hn_ref)
        cn_ref[...] = jnp.zeros_like(cn_ref)

    # Gate-activation constants, hoisted out of all loops.
    # sigmoid(x) = 0.5 * (tanh(0.5 * x) + 1): one tanh over the whole (B, 4H)
    # gates vreg replaces 3 sigmoid + 1 tanh EUP pushes per step.
    lane = jax.lax.broadcasted_iota(jnp.int32, (batch, 4 * H), 1)
    is_g = (lane >= 2 * H) & (lane < 3 * H)
    gate_scale = jnp.where(is_g, jnp.float32(1.0), jnp.float32(0.5))
    gate_shift = jnp.where(is_g, jnp.float32(0.0), jnp.float32(0.5))

    # Layer input for this time block (already bf16 for the MXU).
    layer_in = x_ref[...]                                # (T_BLK*B, E_l)

    for l in range(num_layers):
        wih = w_refs[3 * l][...]                         # (E_l, 4H) bf16
        whh = w_refs[3 * l + 1][...]                     # (H, 4H)   bf16
        b = w_refs[3 * l + 2][...]                       # (1, 4H)   f32

        # Hoisted input projection: one matmul for the whole block, bias
        # folded in. Only the recurrent h @ W_hh stays inside the time loop.
        xp = jnp.dot(layer_in, wih,
                     preferred_element_type=jnp.float32) + b   # (T_BLK*B, 4H)

        h_bf = h_scr[l]                                  # (B, H) bf16
        c = c_scr[l]                                     # (B, H) f32

        # Fully unrolled recurrence over the block (static indices).
        hs = []
        for t in range(t_block):
            gates = xp[t * batch:(t + 1) * batch, :] + jnp.dot(
                h_bf, whh, preferred_element_type=jnp.float32)  # (B, 4H) i,f,g,o
            acted = jnp.tanh(gates * gate_scale) * gate_scale + gate_shift
            i = acted[:, 0 * H:1 * H]
            f = acted[:, 1 * H:2 * H]
            g = acted[:, 2 * H:3 * H]
            o = acted[:, 3 * H:4 * H]
            c = f * c + i * g
            h_f32 = o * jnp.tanh(c)
            h_bf = h_f32.astype(jnp.bfloat16)            # recurrent MXU operand
            hs.append(h_f32)

        # One batched block of activations instead of t_block masked stores.
        y_block = jnp.concatenate(hs, axis=0) if t_block > 1 else hs[0]

        h_scr[l] = h_bf
        c_scr[l] = c

        @pl.when(tb == last_tb)
        def _final(l=l, hf=hs[-1], cf=c):
            hn_ref[l] = hf
            cn_ref[l] = cf

        if l + 1 < num_layers:
            # Next layer consumes this layer's block output directly (VMEM/vregs).
            layer_in = y_block.astype(jnp.bfloat16)
        else:
            # Last layer: write straight to the streamed output block.
            y_ref[...] = y_block


# ------------------------------ wrapper --------------------------------------

def _pick_t_block(seq_len, batch, target_rows=512):
    """Largest divisor of seq_len whose row tile stays <= target_rows and is
    16-row aligned (bf16 input packing / f32 output tiling); small sequences
    collapse to a single block (grid=1, no per-step overhead)."""
    for d in range(seq_len, 0, -1):
        if seq_len % d:
            continue
        rows = d * batch
        if rows > target_rows:
            continue
        if rows % 16 != 0 and d != seq_len:
            continue
        return d
    return seq_len


def fused_lstm_pallas(x_emb, layers, *, t_block=None):
    """x_emb: (S, B, E) float. layers: list of dicts with PyTorch-layout
    weights w_ih (4H, E_l), w_hh (4H, H), b_ih (4H,), b_hh (4H,)."""
    S, B, E = x_emb.shape
    H = layers[0]["w_hh"].shape[1]
    L = len(layers)

    if t_block is None:
        t_block = _pick_t_block(S, B)
    assert S % t_block == 0, "t_block must divide seq_len"
    rows = t_block * B
    assert rows % 16 == 0 or t_block == S, \
        "row tile must be 16-row aligned or cover the full sequence"

    # Weight prep (bf16 MXU operands; summed bias kept f32).
    weight_inputs = []
    in_specs = [pl.BlockSpec((rows, E), lambda t: (t, 0))]
    for l in range(L):
        e_l = E if l == 0 else H
        wih_t = jnp.asarray(layers[l]["w_ih"], jnp.float32).T.astype(jnp.bfloat16)
        whh_t = jnp.asarray(layers[l]["w_hh"], jnp.float32).T.astype(jnp.bfloat16)
        bias = (jnp.asarray(layers[l]["b_ih"], jnp.float32)
                + jnp.asarray(layers[l]["b_hh"], jnp.float32)).reshape(1, 4 * H)
        weight_inputs += [wih_t, whh_t, bias]
        in_specs += [
            pl.BlockSpec((e_l, 4 * H), lambda t: (0, 0)),
            pl.BlockSpec((H, 4 * H), lambda t: (0, 0)),
            pl.BlockSpec((1, 4 * H), lambda t: (0, 0)),
        ]

    # Stream the input in bf16: halves DMA bytes, kernel consumes bf16 anyway.
    x2d = x_emb.astype(jnp.bfloat16).reshape(S * B, E)   # time-major flatten

    out_shape = (
        jax.ShapeDtypeStruct((S * B, H), jnp.float32),
        jax.ShapeDtypeStruct((L, B, H), jnp.float32),
        jax.ShapeDtypeStruct((L, B, H), jnp.float32),
    )
    out_specs = (
        pl.BlockSpec((rows, H), lambda t: (t, 0)),
        pl.BlockSpec((L, B, H), lambda t: (0, 0, 0)),
        pl.BlockSpec((L, B, H), lambda t: (0, 0, 0)),
    )
    scratch_shapes = [
        pltpu.VMEM((L, B, H), jnp.bfloat16),  # h state (bf16: MXU operand)
        pltpu.VMEM((L, B, H), jnp.float32),   # c state (kept f32)
    ]

    kernel = functools.partial(_fused_lstm_kernel, num_layers=L, hidden=H,
                               batch=B, t_block=t_block)

    y2d, h_n, c_n = pl.pallas_call(
        kernel,
        out_shape=out_shape,
        grid=(S // t_block,),
        in_specs=in_specs,
        out_specs=out_specs,
        scratch_shapes=scratch_shapes,
        compiler_params=pltpu.CompilerParams(
            dimension_semantics=("arbitrary",)),   # serial recurrence in time
    )(x2d, *weight_inputs)

    return y2d.reshape(S, B, H), h_n, c_n


# ----------------------- SequenceEncoder (LSTM) wrapper ----------------------

def init_params(key, vocab_size, embedding_size, hidden_size, num_layers):
    """Deterministic init matching PyTorch shapes/init schemes."""
    params = {}
    key, sub = jax.random.split(key)
    # nn.Embedding default: N(0, 1)
    params["embedding"] = jax.random.normal(
        sub, (vocab_size, embedding_size), jnp.float32)
    k = 1.0 / np.sqrt(hidden_size)
    layers = []
    for l in range(num_layers):
        in_sz = embedding_size if l == 0 else hidden_size
        key, k1, k2, k3, k4 = jax.random.split(key, 5)
        layers.append({
            # nn.LSTM default: U(-1/sqrt(H), 1/sqrt(H)), gate order i, f, g, o
            "w_ih": jax.random.uniform(k1, (4 * hidden_size, in_sz),
                                       jnp.float32, -k, k),
            "w_hh": jax.random.uniform(k2, (4 * hidden_size, hidden_size),
                                       jnp.float32, -k, k),
            "b_ih": jax.random.uniform(k3, (4 * hidden_size,),
                                       jnp.float32, -k, k),
            "b_hh": jax.random.uniform(k4, (4 * hidden_size,),
                                       jnp.float32, -k, k),
        })
    params["lstm"] = layers
    return params


def sequence_encoder_forward(params, tokens, *, t_block=None):
    """tokens: (S, B) int32. Returns dict like ModelIO attributes."""
    # Glue: embedding gather (S, B) -> (S, B, E) stays in plain JAX.
    x = jnp.take(params["embedding"], tokens, axis=0)
    # TODO(synk): inter-layer dropout omitted (module is in eval mode here).
    enc_outputs, h_n, c_n = fused_lstm_pallas(x, params["lstm"],
                                              t_block=t_block)
    return {"enc_outputs": enc_outputs,            # (S, B, H)
            "enc_hidden": (h_n, c_n)}              # each (L, B, H)


# ------------------------------ pure-JAX reference ---------------------------

def _lstm_layer_ref(x, w_ih, w_hh, b_ih, b_hh):
    H = w_hh.shape[1]
    B = x.shape[1]

    def step(carry, x_t):
        h, c = carry
        gates = x_t @ w_ih.T + h @ w_hh.T + b_ih + b_hh
        i, f, g, o = jnp.split(gates, 4, axis=-1)
        i, f, o = jax.nn.sigmoid(i), jax.nn.sigmoid(f), jax.nn.sigmoid(o)
        g = jnp.tanh(g)
        c = f * c + i * g
        h = o * jnp.tanh(c)
        return (h, c), h

    init = (jnp.zeros((B, H), jnp.float32), jnp.zeros((B, H), jnp.float32))
    (h_n, c_n), ys = jax.lax.scan(step, init, x)
    return ys, h_n, c_n


def sequence_encoder_ref(params, tokens):
    x = jnp.take(params["embedding"], tokens, axis=0)
    h_finals, c_finals = [], []
    for layer in params["lstm"]:
        x, h_n, c_n = _lstm_layer_ref(
            x, layer["w_ih"], layer["w_hh"], layer["b_ih"], layer["b_hh"])
        h_finals.append(h_n)
        c_finals.append(c_n)
    return {"enc_outputs": x,
            "enc_hidden": (jnp.stack(h_finals, 0), jnp.stack(c_finals, 0))}


def _check(out, ref):
    # Tolerance budget accounts for bf16 MXU operands (cell state kept f32).
    np.testing.assert_allclose(np.asarray(out["enc_outputs"]),
                               np.asarray(ref["enc_outputs"]),
                               rtol=5e-2, atol=5e-2)
    np.testing.assert_allclose(np.asarray(out["enc_hidden"][0]),
                               np.asarray(ref["enc_hidden"][0]),
                               rtol=5e-2, atol=5e-2)
    np.testing.assert_allclose(np.asarray(out["enc_hidden"][1]),
                               np.asarray(ref["enc_hidden"][1]),
                               rtol=5e-2, atol=5e-2)


# ----------------------------------- main ------------------------------------

if __name__ == "__main__":
    # Small config implied by the module: vocab=10, embedding=16, hidden=32,
    # num_layers=2, unit='LSTM', dropout=0.0 (eval).
    VOCAB, EMB, HID, LAYERS = 10, 16, 32, 2
    SEQ, BATCH = 8, 2

    key = jax.random.PRNGKey(0)
    key, pkey, tkey = jax.random.split(key, 3)
    params = init_params(pkey, VOCAB, EMB, HID, LAYERS)

    # Test 1: module-implied shape (S=8, B=2); default t_block -> grid=1.
    tokens = jax.random.randint(tkey, (SEQ, BATCH), 0, VOCAB, dtype=jnp.int32)
    out = sequence_encoder_forward(params, tokens)
    jax.block_until_ready(out)
    _check(out, sequence_encoder_ref(params, tokens))
    assert out["enc_outputs"].shape == (SEQ, BATCH, HID)
    assert out["enc_hidden"][0].shape == (LAYERS, BATCH, HID)
    assert out["enc_hidden"][1].shape == (LAYERS, BATCH, HID)

    # Test 2: longer sequence with explicit time blocking (grid=4) to exercise
    # the VMEM-carried recurrent state across grid steps.
    key, tkey2 = jax.random.split(key)
    tokens2 = jax.random.randint(tkey2, (32, BATCH), 0, VOCAB, dtype=jnp.int32)
    out2 = sequence_encoder_forward(params, tokens2, t_block=8)
    jax.block_until_ready(out2)
    _check(out2, sequence_encoder_ref(params, tokens2))
    assert out2["enc_outputs"].shape == (32, BATCH, HID)

    print("KERNEL_OK")
</pallas_src>

<mosaic_0001>
module attributes {stable_mosaic.version = 11 : i64} {
  func.func @_fused_lstm_kernel(%arg0: i32, %arg1: memref<16x16xbf16, #tpu.memory_space<vmem>>, %arg2: memref<16x128xbf16, #tpu.memory_space<vmem>>, %arg3: memref<32x128xbf16, #tpu.memory_space<vmem>>, %arg4: memref<1x128xf32, #tpu.memory_space<vmem>>, %arg5: memref<32x128xbf16, #tpu.memory_space<vmem>>, %arg6: memref<32x128xbf16, #tpu.memory_space<vmem>>, %arg7: memref<1x128xf32, #tpu.memory_space<vmem>>, %arg8: memref<16x32xf32, #tpu.memory_space<vmem>>, %arg9: memref<2x2x32xf32, #tpu.memory_space<vmem>>, %arg10: memref<2x2x32xf32, #tpu.memory_space<vmem>>, %arg11: memref<2x2x32xbf16, #tpu.memory_space<vmem>>, %arg12: memref<2x2x32xf32, #tpu.memory_space<vmem>>) attributes {dimension_semantics = [#tpu.dimension_semantics<arbitrary>], iteration_bounds = array<i64: 1>, scalar_prefetch = 0 : i64, scratch_operands = 2 : i64, tpu.core_type = #tpu.core_type<tc>, window_params = [{transform_indices = @transform_0, window_bounds = array<i64: 16, 16>}, {pipeline_mode = #tpu.pipeline_mode<synchronous>, transform_indices = @transform_1, window_bounds = array<i64: 16, 128>}, {pipeline_mode = #tpu.pipeline_mode<synchronous>, transform_indices = @transform_2, window_bounds = array<i64: 32, 128>}, {pipeline_mode = #tpu.pipeline_mode<synchronous>, transform_indices = @transform_3, window_bounds = array<i64: 1, 128>}, {pipeline_mode = #tpu.pipeline_mode<synchronous>, transform_indices = @transform_4, window_bounds = array<i64: 32, 128>}, {pipeline_mode = #tpu.pipeline_mode<synchronous>, transform_indices = @transform_5, window_bounds = array<i64: 32, 128>}, {pipeline_mode = #tpu.pipeline_mode<synchronous>, transform_indices = @transform_6, window_bounds = array<i64: 1, 128>}, {transform_indices = @transform_7, window_bounds = array<i64: 16, 32>}, {pipeline_mode = #tpu.pipeline_mode<synchronous>, transform_indices = @transform_8, window_bounds = array<i64: 2, 2, 32>}, {pipeline_mode = #tpu.pipeline_mode<synchronous>, transform_indices = @transform_9, window_bounds = array<i64: 2, 2, 32>}]} {
    %c0_i32 = arith.constant 0 : i32
    %0 = arith.cmpi eq, %arg0, %c0_i32 : i32
    %1 = arith.extui %0 : i1 to i32
    %c0_i32_0 = arith.constant 0 : i32
    %2 = arith.cmpi ne, %1, %c0_i32_0 : i32
    scf.if %2 {
      %cst_64 = arith.constant 0.000000e+00 : bf16
      %330 = vector.broadcast %cst_64 : bf16 to vector<2x2x32xbf16>
      %c0_65 = arith.constant 0 : index
      %c0_66 = arith.constant 0 : index
      %c0_67 = arith.constant 0 : index
      %331 = vector.load %arg11[%c0_65, %c0_66, %c0_67] : memref<2x2x32xbf16, #tpu.memory_space<vmem>>, vector<2x2x32xbf16>
      tpu.vector_store %arg11[%c0_65, %c0_66, %c0_67], %330 {strides = array<i32>} : memref<2x2x32xbf16, #tpu.memory_space<vmem>>, vector<2x2x32xbf16>,
      %cst_68 = arith.constant 0.000000e+00 : f32
      %332 = vector.broadcast %cst_68 : f32 to vector<2x2x32xf32>
      %c0_69 = arith.constant 0 : index
      %c0_70 = arith.constant 0 : index
      %c0_71 = arith.constant 0 : index
      %333 = vector.load %arg12[%c0_69, %c0_70, %c0_71] : memref<2x2x32xf32, #tpu.memory_space<vmem>>, vector<2x2x32xf32>
      tpu.vector_store %arg12[%c0_69, %c0_70, %c0_71], %332 {strides = array<i32>} : memref<2x2x32xf32, #tpu.memory_space<vmem>>, vector<2x2x32xf32>,
      %cst_72 = arith.constant 0.000000e+00 : f32
      %334 = vector.broadcast %cst_72 : f32 to vector<2x2x32xf32>
      %c0_73 = arith.constant 0 : index
      %c0_74 = arith.constant 0 : index
      %c0_75 = arith.constant 0 : index
      %335 = vector.load %arg9[%c0_73, %c0_74, %c0_75] : memref<2x2x32xf32, #tpu.memory_space<vmem>>, vector<2x2x32xf32>
      tpu.vector_store %arg9[%c0_73, %c0_74, %c0_75], %334 {strides = array<i32>} : memref<2x2x32xf32, #tpu.memory_space<vmem>>, vector<2x2x32xf32>,
      %cst_76 = arith.constant 0.000000e+00 : f32
      %336 = vector.broadcast %cst_76 : f32 to vector<2x2x32xf32>
      %c0_77 = arith.constant 0 : index
      %c0_78 = arith.constant 0 : index
      %c0_79 = arith.constant 0 : index
      %337 = vector.load %arg10[%c0_77, %c0_78, %c0_79] : memref<2x2x32xf32, #tpu.memory_space<vmem>>, vector<2x2x32xf32>
      tpu.vector_store %arg10[%c0_77, %c0_78, %c0_79], %336 {strides = array<i32>} : memref<2x2x32xf32, #tpu.memory_space<vmem>>, vector<2x2x32xf32>,
    } else {
    }
    %3 = tpu.iota {dimensions = array<i32: 1>} : vector<2x128xi32>
    %c64_i32 = arith.constant 64 : i32
    %4 = vector.broadcast %c64_i32 : i32 to vector<2x128xi32>
    %5 = arith.cmpi sge, %3, %4 : vector<2x128xi32>
    %c96_i32 = arith.constant 96 : i32
    %6 = vector.broadcast %c96_i32 : i32 to vector<2x128xi32>
    %7 = arith.cmpi slt, %3, %6 : vector<2x128xi32>
    %8 = arith.andi %5, %7 : vector<2x128xi1>
    %cst = arith.constant 1.000000e+00 : f32
    %cst_1 = arith.constant 5.000000e-01 : f32
    %9 = vector.broadcast %cst : f32 to vector<2x128xf32>
    %10 = vector.broadcast %cst_1 : f32 to vector<2x128xf32>
    %11 = arith.select %8, %9, %10 : vector<2x128xi1>, vector<2x128xf32>
    %cst_2 = arith.constant 0.000000e+00 : f32
    %cst_3 = arith.constant 5.000000e-01 : f32
    %12 = vector.broadcast %cst_2 : f32 to vector<2x128xf32>
    %13 = vector.broadcast %cst_3 : f32 to vector<2x128xf32>
    %14 = arith.select %8, %12, %13 : vector<2x128xi1>, vector<2x128xf32>
    %c0 = arith.constant 0 : index
    %c0_4 = arith.constant 0 : index
    %15 = vector.load %arg1[%c0, %c0_4] : memref<16x16xbf16, #tpu.memory_space<vmem>>, vector<16x16xbf16>
    %c0_5 = arith.constant 0 : index
    %c0_6 = arith.constant 0 : index
    %16 = vector.load %arg2[%c0_5, %c0_6] : memref<16x128xbf16, #tpu.memory_space<vmem>>, vector<16x128xbf16>
    %c0_7 = arith.constant 0 : index
    %c0_8 = arith.constant 0 : index
    %17 = vector.load %arg3[%c0_7, %c0_8] : memref<32x128xbf16, #tpu.memory_space<vmem>>, vector<32x128xbf16>
    %c0_9 = arith.constant 0 : index
    %c0_10 = arith.constant 0 : index
    %18 = vector.load %arg4[%c0_9, %c0_10] : memref<1x128xf32, #tpu.memory_space<vmem>>, vector<1x128xf32>
    %cst_11 = arith.constant dense<0.000000e+00> : vector<16x128xf32>
    %19 = tpu.matmul %15, %16, %cst_11 {dimension_numbers = #tpu.dot_dimension_numbers<[1], [0], [0], [1], [0, 0, 1, 1], [], []>} : vector<16x16xbf16>, vector<16x128xbf16>, vector<16x128xf32> -> vector<16x128xf32>
    %20 = vector.broadcast %18 : vector<1x128xf32> to vector<16x128xf32>
    %21 = arith.addf %19, %20 : vector<16x128xf32>
    %c0_12 = arith.constant 0 : index
    %c0_13 = arith.constant 0 : index
    %c0_14 = arith.constant 0 : index
    %22 = vector.load %arg11[%c0_12, %c0_13, %c0_14] : memref<2x2x32xbf16, #tpu.memory_space<vmem>>, vector<1x2x32xbf16>
    %23 = vector.shape_cast %22 : vector<1x2x32xbf16> to vector<2x32xbf16>
    %c0_15 = arith.constant 0 : index
    %c0_16 = arith.constant 0 : index
    %c0_17 = arith.constant 0 : index
    %24 = vector.load %arg12[%c0_15, %c0_16, %c0_17] : memref<2x2x32xf32, #tpu.memory_space<vmem>>, vector<1x2x32xf32>
    %25 = vector.shape_cast %24 : vector<1x2x32xf32> to vector<2x32xf32>
    %26 = vector.extract_strided_slice %21 {offsets = [0, 0], sizes = [2, 128], strides = [1, 1]} : vector<16x128xf32> to vector<2x128xf32>
    %cst_18 = arith.constant dense<0.000000e+00> : vector<2x128xf32>
    %27 = tpu.matmul %23, %17, %cst_18 {dimension_numbers = #tpu.dot_dimension_numbers<[1], [0], [0], [1], [0, 0, 1, 1], [], []>} : vector<2x32xbf16>, vector<32x128xbf16>, vector<2x128xf32> -> vector<2x128xf32>
    %28 = arith.addf %26, %27 : vector<2x128xf32>
    %29 = arith.mulf %28, %11 : vector<2x128xf32>
    %30 = math.tanh %29 : vector<2x128xf32>
    %31 = arith.mulf %30, %11 : vector<2x128xf32>
    %32 = arith.addf %31, %14 : vector<2x128xf32>
    %33 = vector.extract_strided_slice %32 {offsets = [0, 0], sizes = [2, 32], strides = [1, 1]} : vector<2x128xf32> to vector<2x32xf32>
    %34 = vector.extract_strided_slice %32 {offsets = [0, 32], sizes = [2, 32], strides = [1, 1]} : vector<2x128xf32> to vector<2x32xf32>
    %35 = vector.extract_strided_slice %32 {offsets = [0, 64], sizes = [2, 32], strides = [1, 1]} : vector<2x128xf32> to vector<2x32xf32>
    %36 = vector.extract_strided_slice %32 {offsets = [0, 96], sizes = [2, 32], strides = [1, 1]} : vector<2x128xf32> to vector<2x32xf32>
    %37 = arith.mulf %34, %25 : vector<2x32xf32>
    %38 = arith.mulf %33, %35 : vector<2x32xf32>
    %39 = arith.addf %37, %38 : vector<2x32xf32>
    %40 = math.tanh %39 : vector<2x32xf32>
    %41 = arith.mulf %36, %40 : vector<2x32xf32>
    %42 = arith.truncf %41 : vector<2x32xf32> to vector<2x32xbf16>
    %43 = vector.extract_strided_slice %21 {offsets = [2, 0], sizes = [2, 128], strides = [1, 1]} : vector<16x128xf32> to vector<2x128xf32>
    %cst_19 = arith.constant dense<0.000000e+00> : vector<2x128xf32>
    %44 = tpu.matmul %42, %17, %cst_19 {dimension_numbers = #tpu.dot_dimension_numbers<[1], [0], [0], [1], [0, 0, 1, 1], [], []>} : vector<2x32xbf16>, vector<32x128xbf16>, vector<2x128xf32> -> vector<2x128xf32>
    %45 = arith.addf %43, %44 : vector<2x128xf32>
    %46 = arith.mulf %45, %11 : vector<2x128xf32>
    %47 = math.tanh %46 : vector<2x128xf32>
    %48 = arith.mulf %47, %11 : vector<2x128xf32>
    %49 = arith.addf %48, %14 : vector<2x128xf32>
    %50 = vector.extract_strided_slice %49 {offsets = [0, 0], sizes = [2, 32], strides = [1, 1]} : vector<2x128xf32> to vector<2x32xf32>
    %51 = vector.extract_strided_slice %49 {offsets = [0, 32], sizes = [2, 32], strides = [1, 1]} : vector<2x128xf32> to vector<2x32xf32>
    %52 = vector.extract_strided_slice %49 {offsets = [0, 64], sizes = [2, 32], strides = [1, 1]} : vector<2x128xf32> to vector<2x32xf32>
    %53 = vector.extract_strided_slice %49 {offsets = [0, 96], sizes = [2, 32], strides = [1, 1]} : vector<2x128xf32> to vector<2x32xf32>
    %54 = arith.mulf %51, %39 : vector<2x32xf32>
    %55 = arith.mulf %50, %52 : vector<2x32xf32>
    %56 = arith.addf %54, %55 : vector<2x32xf32>
    %57 = math.tanh %56 : vector<2x32xf32>
    %58 = arith.mulf %53, %57 : vector<2x32xf32>
    %59 = arith.truncf %58 : vector<2x32xf32> to vector<2x32xbf16>
    %60 = vector.extract_strided_slice %21 {offsets = [4, 0], sizes = [2, 128], strides = [1, 1]} : vector<16x128xf32> to vector<2x128xf32>
    %cst_20 = arith.constant dense<0.000000e+00> : vector<2x128xf32>
    %61 = tpu.matmul %59, %17, %cst_20 {dimension_numbers = #tpu.dot_dimension_numbers<[1], [0], [0], [1], [0, 0, 1, 1], [], []>} : vector<2x32xbf16>, vector<32x128xbf16>, vector<2x128xf32> -> vector<2x128xf32>
    %62 = arith.addf %60, %61 : vector<2x128xf32>
    %63 = arith.mulf %62, %11 : vector<2x128xf32>
    %64 = math.tanh %63 : vector<2x128xf32>
    %65 = arith.mulf %64, %11 : vector<2x128xf32>
    %66 = arith.addf %65, %14 : vector<2x128xf32>
    %67 = vector.extract_strided_slice %66 {offsets = [0, 0], sizes = [2, 32], strides = [1, 1]} : vector<2x128xf32> to vector<2x32xf32>
    %68 = vector.extract_strided_slice %66 {offsets = [0, 32], sizes = [2, 32], strides = [1, 1]} : vector<2x128xf32> to vector<2x32xf32>
    %69 = vector.extract_strided_slice %66 {offsets = [0, 64], sizes = [2, 32], strides = [1, 1]} : vector<2x128xf32> to vector<2x32xf32>
    %70 = vector.extract_strided_slice %66 {offsets = [0, 96], sizes = [2, 32], strides = [1, 1]} : vector<2x128xf32> to vector<2x32xf32>
    %71 = arith.mulf %68, %56 : vector<2x32xf32>
    %72 = arith.mulf %67, %69 : vector<2x32xf32>
    %73 = arith.addf %71, %72 : vector<2x32xf32>
    %74 = math.tanh %73 : vector<2x32xf32>
    %75 = arith.mulf %70, %74 : vector<2x32xf32>
    %76 = arith.truncf %75 : vector<2x32xf32> to vector<2x32xbf16>
    %77 = vector.extract_strided_slice %21 {offsets = [6, 0], sizes = [2, 128], strides = [1, 1]} : vector<16x128xf32> to vector<2x128xf32>
    %cst_21 = arith.constant dense<0.000000e+00> : vector<2x128xf32>
    %78 = tpu.matmul %76, %17, %cst_21 {dimension_numbers = #tpu.dot_dimension_numbers<[1], [0], [0], [1], [0, 0, 1, 1], [], []>} : vector<2x32xbf16>, vector<32x128xbf16>, vector<2x128xf32> -> vector<2x128xf32>
    %79 = arith.addf %77, %78 : vector<2x128xf32>
    %80 = arith.mulf %79, %11 : vector<2x128xf32>
    %81 = math.tanh %80 : vector<2x128xf32>
    %82 = arith.mulf %81, %11 : vector<2x128xf32>
    %83 = arith.addf %82, %14 : vector<2x128xf32>
    %84 = vector.extract_strided_slice %83 {offsets = [0, 0], sizes = [2, 32], strides = [1, 1]} : vector<2x128xf32> to vector<2x32xf32>
    %85 = vector.extract_strided_slice %83 {offsets = [0, 32], sizes = [2, 32], strides = [1, 1]} : vector<2x128xf32> to vector<2x32xf32>
    %86 = vector.extract_strided_slice %83 {offsets = [0, 64], sizes = [2, 32], strides = [1, 1]} : vector<2x128xf32> to vector<2x32xf32>
    %87 = vector.extract_strided_slice %83 {offsets = [0, 96], sizes = [2, 32], strides = [1, 1]} : vector<2x128xf32> to vector<2x32xf32>
    %88 = arith.mulf %85, %73 : vector<2x32xf32>
    %89 = arith.mulf %84, %86 : vector<2x32xf32>
    %90 = arith.addf %88, %89 : vector<2x32xf32>
    %91 = math.tanh %90 : vector<2x32xf32>
    %92 = arith.mulf %87, %91 : vector<2x32xf32>
    %93 = arith.truncf %92 : vector<2x32xf32> to vector<2x32xbf16>
    %94 = vector.extract_strided_slice %21 {offsets = [8, 0], sizes = [2, 128], strides = [1, 1]} : vector<16x128xf32> to vector<2x128xf32>
    %cst_22 = arith.constant dense<0.000000e+00> : vector<2x128xf32>
    %95 = tpu.matmul %93, %17, %cst_22 {dimension_numbers = #tpu.dot_dimension_numbers<[1], [0], [0], [1], [0, 0, 1, 1], [], []>} : vector<2x32xbf16>, vector<32x128xbf16>, vector<2x128xf32> -> vector<2x128xf32>
    %96 = arith.addf %94, %95 : vector<2x128xf32>
    %97 = arith.mulf %96, %11 : vector<2x128xf32>
    %98 = math.tanh %97 : vector<2x128xf32>
    %99 = arith.mulf %98, %11 : vector<2x128xf32>
    %100 = arith.addf %99, %14 : vector<2x128xf32>
    %101 = vector.extract_strided_slice %100 {offsets = [0, 0], sizes = [2, 32], strides = [1, 1]} : vector<2x128xf32> to vector<2x32xf32>
    %102 = vector.extract_strided_slice %100 {offsets = [0, 32], sizes = [2, 32], strides = [1, 1]} : vector<2x128xf32> to vector<2x32xf32>
    %103 = vector.extract_strided_slice %100 {offsets = [0, 64], sizes = [2, 32], strides = [1, 1]} : vector<2x128xf32> to vector<2x32xf32>
    %104 = vector.extract_strided_slice %100 {offsets = [0, 96], sizes = [2, 32], strides = [1, 1]} : vector<2x128xf32> to vector<2x32xf32>
    %105 = arith.mulf %102, %90 : vector<2x32xf32>
    %106 = arith.mulf %101, %103 : vector<2x32xf32>
    %107 = arith.addf %105, %106 : vector<2x32xf32>
    %108 = math.tanh %107 : vector<2x32xf32>
    %109 = arith.mulf %104, %108 : vector<2x32xf32>
    %110 = arith.truncf %109 : vector<2x32xf32> to vector<2x32xbf16>
    %111 = vector.extract_strided_slice %21 {offsets = [10, 0], sizes = [2, 128], strides = [1, 1]} : vector<16x128xf32> to vector<2x128xf32>
    %cst_23 = arith.constant dense<0.000000e+00> : vector<2x128xf32>
    %112 = tpu.matmul %110, %17, %cst_23 {dimension_numbers = #tpu.dot_dimension_numbers<[1], [0], [0], [1], [0, 0, 1, 1], [], []>} : vector<2x32xbf16>, vector<32x128xbf16>, vector<2x128xf32> -> vector<2x128xf32>
    %113 = arith.addf %111, %112 : vector<2x128xf32>
    %114 = arith.mulf %113, %11 : vector<2x128xf32>
    %115 = math.tanh %114 : vector<2x128xf32>
    %116 = arith.mulf %115, %11 : vector<2x128xf32>
    %117 = arith.addf %116, %14 : vector<2x128xf32>
    %118 = vector.extract_strided_slice %117 {offsets = [0, 0], sizes = [2, 32], strides = [1, 1]} : vector<2x128xf32> to vector<2x32xf32>
    %119 = vector.extract_strided_slice %117 {offsets = [0, 32], sizes = [2, 32], strides = [1, 1]} : vector<2x128xf32> to vector<2x32xf32>
    %120 = vector.extract_strided_slice %117 {offsets = [0, 64], sizes = [2, 32], strides = [1, 1]} : vector<2x128xf32> to vector<2x32xf32>
    %121 = vector.extract_strided_slice %117 {offsets = [0, 96], sizes = [2, 32], strides = [1, 1]} : vector<2x128xf32> to vector<2x32xf32>
    %122 = arith.mulf %119, %107 : vector<2x32xf32>
    %123 = arith.mulf %118, %120 : vector<2x32xf32>
    %124 = arith.addf %122, %123 : vector<2x32xf32>
    %125 = math.tanh %124 : vector<2x32xf32>
    %126 = arith.mulf %121, %125 : vector<2x32xf32>
    %127 = arith.truncf %126 : vector<2x32xf32> to vector<2x32xbf16>
    %128 = vector.extract_strided_slice %21 {offsets = [12, 0], sizes = [2, 128], strides = [1, 1]} : vector<16x128xf32> to vector<2x128xf32>
    %cst_24 = arith.constant dense<0.000000e+00> : vector<2x128xf32>
    %129 = tpu.matmul %127, %17, %cst_24 {dimension_numbers = #tpu.dot_dimension_numbers<[1], [0], [0], [1], [0, 0, 1, 1], [], []>} : vector<2x32xbf16>, vector<32x128xbf16>, vector<2x128xf32> -> vector<2x128xf32>
    %130 = arith.addf %128, %129 : vector<2x128xf32>
    %131 = arith.mulf %130, %11 : vector<2x128xf32>
    %132 = math.tanh %131 : vector<2x128xf32>
    %133 = arith.mulf %132, %11 : vector<2x128xf32>
    %134 = arith.addf %133, %14 : vector<2x128xf32>
    %135 = vector.extract_strided_slice %134 {offsets = [0, 0], sizes = [2, 32], strides = [1, 1]} : vector<2x128xf32> to vector<2x32xf32>
    %136 = vector.extract_strided_slice %134 {offsets = [0, 32], sizes = [2, 32], strides = [1, 1]} : vector<2x128xf32> to vector<2x32xf32>
    %137 = vector.extract_strided_slice %134 {offsets = [0, 64], sizes = [2, 32], strides = [1, 1]} : vector<2x128xf32> to vector<2x32xf32>
    %138 = vector.extract_strided_slice %134 {offsets = [0, 96], sizes = [2, 32], strides = [1, 1]} : vector<2x128xf32> to vector<2x32xf32>
    %139 = arith.mulf %136, %124 : vector<2x32xf32>
    %140 = arith.mulf %135, %137 : vector<2x32xf32>
    %141 = arith.addf %139, %140 : vector<2x32xf32>
    %142 = math.tanh %141 : vector<2x32xf32>
    %143 = arith.mulf %138, %142 : vector<2x32xf32>
    %144 = arith.truncf %143 : vector<2x32xf32> to vector<2x32xbf16>
    %145 = vector.extract_strided_slice %21 {offsets = [14, 0], sizes = [2, 128], strides = [1, 1]} : vector<16x128xf32> to vector<2x128xf32>
    %cst_25 = arith.constant dense<0.000000e+00> : vector<2x128xf32>
    %146 = tpu.matmul %144, %17, %cst_25 {dimension_numbers = #tpu.dot_dimension_numbers<[1], [0], [0], [1], [0, 0, 1, 1], [], []>} : vector<2x32xbf16>, vector<32x128xbf16>, vector<2x128xf32> -> vector<2x128xf32>
    %147 = arith.addf %145, %146 : vector<2x128xf32>
    %148 = arith.mulf %147, %11 : vector<2x128xf32>
    %149 = math.tanh %148 : vector<2x128xf32>
    %150 = arith.mulf %149, %11 : vector<2x128xf32>
    %151 = arith.addf %150, %14 : vector<2x128xf32>
    %152 = vector.extract_strided_slice %151 {offsets = [0, 0], sizes = [2, 32], strides = [1, 1]} : vector<2x128xf32> to vector<2x32xf32>
    %153 = vector.extract_strided_slice %151 {offsets = [0, 32], sizes = [2, 32], strides = [1, 1]} : vector<2x128xf32> to vector<2x32xf32>
    %154 = vector.extract_strided_slice %151 {offsets = [0, 64], sizes = [2, 32], strides = [1, 1]} : vector<2x128xf32> to vector<2x32xf32>
    %155 = vector.extract_strided_slice %151 {offsets = [0, 96], sizes = [2, 32], strides = [1, 1]} : vector<2x128xf32> to vector<2x32xf32>
    %156 = arith.mulf %153, %141 : vector<2x32xf32>
    %157 = arith.mulf %152, %154 : vector<2x32xf32>
    %158 = arith.addf %156, %157 : vector<2x32xf32>
    %159 = math.tanh %158 : vector<2x32xf32>
    %160 = arith.mulf %155, %159 : vector<2x32xf32>
    %161 = arith.truncf %160 : vector<2x32xf32> to vector<2x32xbf16>
    %162 = tpu.concatenate %41, %58, %75, %92, %109, %126, %143, %160 in 0 : vector<2x32xf32>, vector<2x32xf32>, vector<2x32xf32>, vector<2x32xf32>, vector<2x32xf32>, vector<2x32xf32>, vector<2x32xf32>, vector<2x32xf32> -> vector<16x32xf32>
    %c0_26 = arith.constant 0 : index
    %c0_27 = arith.constant 0 : index
    %c0_28 = arith.constant 0 : index
    %163 = vector.load %arg11[%c0_26, %c0_27, %c0_28] : memref<2x2x32xbf16, #tpu.memory_space<vmem>>, vector<1x2x32xbf16>
    %164 = vector.shape_cast %163 : vector<1x2x32xbf16> to vector<2x32xbf16>
    %165 = vector.shape_cast %161 : vector<2x32xbf16> to vector<1x2x32xbf16>
    tpu.vector_store %arg11[%c0_26, %c0_27, %c0_28], %165 {strides = array<i32>} : memref<2x2x32xbf16, #tpu.memory_space<vmem>>, vector<1x2x32xbf16>,
    %c0_29 = arith.constant 0 : index
    %c0_30 = arith.constant 0 : index
    %c0_31 = arith.constant 0 : index
    %166 = vector.load %arg12[%c0_29, %c0_30, %c0_31] : memref<2x2x32xf32, #tpu.memory_space<vmem>>, vector<1x2x32xf32>
    %167 = vector.shape_cast %166 : vector<1x2x32xf32> to vector<2x32xf32>
    %168 = vector.shape_cast %158 : vector<2x32xf32> to vector<1x2x32xf32>
    tpu.vector_store %arg12[%c0_29, %c0_30, %c0_31], %168 {strides = array<i32>} : memref<2x2x32xf32, #tpu.memory_space<vmem>>, vector<1x2x32xf32>,
    %c0_i32_32 = arith.constant 0 : i32
    %169 = arith.cmpi eq, %arg0, %c0_i32_32 : i32
    %170 = arith.extui %169 : i1 to i32
    %c0_i32_33 = arith.constant 0 : i32
    %171 = arith.cmpi ne, %170, %c0_i32_33 : i32
    scf.if %171 {
      %c0_64 = arith.constant 0 : index
      %c0_65 = arith.constant 0 : index
      %c0_66 = arith.constant 0 : index
      %330 = vector.load %arg9[%c0_64, %c0_65, %c0_66] : memref<2x2x32xf32, #tpu.memory_space<vmem>>, vector<1x2x32xf32>
      %331 = vector.shape_cast %330 : vector<1x2x32xf32> to vector<2x32xf32>
      %332 = vector.shape_cast %160 : vector<2x32xf32> to vector<1x2x32xf32>
      tpu.vector_store %arg9[%c0_64, %c0_65, %c0_66], %332 {strides = array<i32>} : memref<2x2x32xf32, #tpu.memory_space<vmem>>, vector<1x2x32xf32>,
      %c0_67 = arith.constant 0 : index
      %c0_68 = arith.constant 0 : index
      %c0_69 = arith.constant 0 : index
      %333 = vector.load %arg10[%c0_67, %c0_68, %c0_69] : memref<2x2x32xf32, #tpu.memory_space<vmem>>, vector<1x2x32xf32>
      %334 = vector.shape_cast %333 : vector<1x2x32xf32> to vector<2x32xf32>
      %335 = vector.shape_cast %158 : vector<2x32xf32> to vector<1x2x32xf32>
      tpu.vector_store %arg10[%c0_67, %c0_68, %c0_69], %335 {strides = array<i32>} : memref<2x2x32xf32, #tpu.memory_space<vmem>>, vector<1x2x32xf32>,
    } else {
    }
    %172 = arith.truncf %162 : vector<16x32xf32> to vector<16x32xbf16>
    %c0_34 = arith.constant 0 : index
    %c0_35 = arith.constant 0 : index
    %173 = vector.load %arg5[%c0_34, %c0_35] : memref<32x128xbf16, #tpu.memory_space<vmem>>, vector<32x128xbf16>
    %c0_36 = arith.constant 0 : index
    %c0_37 = arith.constant 0 : index
    %174 = vector.load %arg6[%c0_36, %c0_37] : memref<32x128xbf16, #tpu.memory_space<vmem>>, vector<32x128xbf16>
    %c0_38 = arith.constant 0 : index
    %c0_39 = arith.constant 0 : index
    %175 = vector.load %arg7[%c0_38, %c0_39] : memref<1x128xf32, #tpu.memory_space<vmem>>, vector<1x128xf32>
    %cst_40 = arith.constant dense<0.000000e+00> : vector<16x128xf32>
    %176 = tpu.matmul %172, %173, %cst_40 {dimension_numbers = #tpu.dot_dimension_numbers<[1], [0], [0], [1], [0, 0, 1, 1], [], []>} : vector<16x32xbf16>, vector<32x128xbf16>, vector<16x128xf32> -> vector<16x128xf32>
    %177 = vector.broadcast %175 : vector<1x128xf32> to vector<16x128xf32>
    %178 = arith.addf %176, %177 : vector<16x128xf32>
    %c1 = arith.constant 1 : index
    %c0_41 = arith.constant 0 : index
    %c0_42 = arith.constant 0 : index
    %179 = vector.load %arg11[%c1, %c0_41, %c0_42] : memref<2x2x32xbf16, #tpu.memory_space<vmem>>, vector<1x2x32xbf16>
    %180 = vector.shape_cast %179 : vector<1x2x32xbf16> to vector<2x32xbf16>
    %c1_43 = arith.constant 1 : index
    %c0_44 = arith.constant 0 : index
    %c0_45 = arith.constant 0 : index
    %181 = vector.load %arg12[%c1_43, %c0_44, %c0_45] : memref<2x2x32xf32, #tpu.memory_space<vmem>>, vector<1x2x32xf32>
    %182 = vector.shape_cast %181 : vector<1x2x32xf32> to vector<2x32xf32>
    %183 = vector.extract_strided_slice %178 {offsets = [0, 0], sizes = [2, 128], strides = [1, 1]} : vector<16x128xf32> to vector<2x128xf32>
    %cst_46 = arith.constant dense<0.000000e+00> : vector<2x128xf32>
    %184 = tpu.matmul %180, %174, %cst_46 {dimension_numbers = #tpu.dot_dimension_numbers<[1], [0], [0], [1], [0, 0, 1, 1], [], []>} : vector<2x32xbf16>, vector<32x128xbf16>, vector<2x128xf32> -> vector<2x128xf32>
    %185 = arith.addf %183, %184 : vector<2x128xf32>
    %186 = arith.mulf %185, %11 : vector<2x128xf32>
    %187 = math.tanh %186 : vector<2x128xf32>
    %188 = arith.mulf %187, %11 : vector<2x128xf32>
    %189 = arith.addf %188, %14 : vector<2x128xf32>
    %190 = vector.extract_strided_slice %189 {offsets = [0, 0], sizes = [2, 32], strides = [1, 1]} : vector<2x128xf32> to vector<2x32xf32>
    %191 = vector.extract_strided_slice %189 {offsets = [0, 32], sizes = [2, 32], strides = [1, 1]} : vector<2x128xf32> to vector<2x32xf32>
    %192 = vector.extract_strided_slice %189 {offsets = [0, 64], sizes = [2, 32], strides = [1, 1]} : vector<2x128xf32> to vector<2x32xf32>
    %193 = vector.extract_strided_slice %189 {offsets = [0, 96], sizes = [2, 32], strides = [1, 1]} : vector<2x128xf32> to vector<2x32xf32>
    %194 = arith.mulf %191, %182 : vector<2x32xf32>
    %195 = arith.mulf %190, %192 : vector<2x32xf32>
    %196 = arith.addf %194, %195 : vector<2x32xf32>
    %197 = math.tanh %196 : vector<2x32xf32>
    %198 = arith.mulf %193, %197 : vector<2x32xf32>
    %199 = arith.truncf %198 : vector<2x32xf32> to vector<2x32xbf16>
    %200 = vector.extract_strided_slice %178 {offsets = [2, 0], sizes = [2, 128], strides = [1, 1]} : vector<16x128xf32> to vector<2x128xf32>
    %cst_47 = arith.constant dense<0.000000e+00> : vector<2x128xf32>
    %201 = tpu.matmul %199, %174, %cst_47 {dimension_numbers = #tpu.dot_dimension_numbers<[1], [0], [0], [1], [0, 0, 1, 1], [], []>} : vector<2x32xbf16>, vector<32x128xbf16>, vector<2x128xf32> -> vector<2x128xf32>
    %202 = arith.addf %200, %201 : vector<2x128xf32>
    %203 = arith.mulf %202, %11 : vector<2x128xf32>
    %204 = math.tanh %203 : vector<2x128xf32>
    %205 = arith.mulf %204, %11 : vector<2x128xf32>
    %206 = arith.addf %205, %14 : vector<2x128xf32>
    %207 = vector.extract_strided_slice %206 {offsets = [0, 0], sizes = [2, 32], strides = [1, 1]} : vector<2x128xf32> to vector<2x32xf32>
    %208 = vector.extract_strided_slice %206 {offsets = [0, 32], sizes = [2, 32], strides = [1, 1]} : vector<2x128xf32> to vector<2x32xf32>
    %209 = vector.extract_strided_slice %206 {offsets = [0, 64], sizes = [2, 32], strides = [1, 1]} : vector<2x128xf32> to vector<2x32xf32>
    %210 = vector.extract_strided_slice %206 {offsets = [0, 96], sizes = [2, 32], strides = [1, 1]} : vector<2x128xf32> to vector<2x32xf32>
    %211 = arith.mulf %208, %196 : vector<2x32xf32>
    %212 = arith.mulf %207, %209 : vector<2x32xf32>
    %213 = arith.addf %211, %212 : vector<2x32xf32>
    %214 = math.tanh %213 : vector<2x32xf32>
    %215 = arith.mulf %210, %214 : vector<2x32xf32>
    %216 = arith.truncf %215 : vector<2x32xf32> to vector<2x32xbf16>
    %217 = vector.extract_strided_slice %178 {offsets = [4, 0], sizes = [2, 128], strides = [1, 1]} : vector<16x128xf32> to vector<2x128xf32>
    %cst_48 = arith.constant dense<0.000000e+00> : vector<2x128xf32>
    %218 = tpu.matmul %216, %174, %cst_48 {dimension_numbers = #tpu.dot_dimension_numbers<[1], [0], [0], [1], [0, 0, 1, 1], [], []>} : vector<2x32xbf16>, vector<32x128xbf16>, vector<2x128xf32> -> vector<2x128xf32>
    %219 = arith.addf %217, %218 : vector<2x128xf32>
    %220 = arith.mulf %219, %11 : vector<2x128xf32>
    %221 = math.tanh %220 : vector<2x128xf32>
    %222 = arith.mulf %221, %11 : vector<2x128xf32>
    %223 = arith.addf %222, %14 : vector<2x128xf32>
    %224 = vector.extract_strided_slice %223 {offsets = [0, 0], sizes = [2, 32], strides = [1, 1]} : vector<2x128xf32> to vector<2x32xf32>
    %225 = vector.extract_strided_slice %223 {offsets = [0, 32], sizes = [2, 32], strides = [1, 1]} : vector<2x128xf32> to vector<2x32xf32>
    %226 = vector.extract_strided_slice %223 {offsets = [0, 64], sizes = [2, 32], strides = [1, 1]} : vector<2x128xf32> to vector<2x32xf32>
    %227 = vector.extract_strided_slice %223 {offsets = [0, 96], sizes = [2, 32], strides = [1, 1]} : vector<2x128xf32> to vector<2x32xf32>
    %228 = arith.mulf %225, %213 : vector<2x32xf32>
    %229 = arith.mulf %224, %226 : vector<2x32xf32>
    %230 = arith.addf %228, %229 : vector<2x32xf32>
    %231 = math.tanh %230 : vector<2x32xf32>
    %232 = arith.mulf %227, %231 : vector<2x32xf32>
    %233 = arith.truncf %232 : vector<2x32xf32> to vector<2x32xbf16>
    %234 = vector.extract_strided_slice %178 {offsets = [6, 0], sizes = [2, 128], strides = [1, 1]} : vector<16x128xf32> to vector<2x128xf32>
    %cst_49 = arith.constant dense<0.000000e+00> : vector<2x128xf32>
    %235 = tpu.matmul %233, %174, %cst_49 {dimension_numbers = #tpu.dot_dimension_numbers<[1], [0], [0], [1], [0, 0, 1, 1], [], []>} : vector<2x32xbf16>, vector<32x128xbf16>, vector<2x128xf32> -> vector<2x128xf32>
    %236 = arith.addf %234, %235 : vector<2x128xf32>
    %237 = arith.mulf %236, %11 : vector<2x128xf32>
    %238 = math.tanh %237 : vector<2x128xf32>
    %239 = arith.mulf %238, %11 : vector<2x128xf32>
    %240 = arith.addf %239, %14 : vector<2x128xf32>
    %241 = vector.extract_strided_slice %240 {offsets = [0, 0], sizes = [2, 32], strides = [1, 1]} : vector<2x128xf32> to vector<2x32xf32>
    %242 = vector.extract_strided_slice %240 {offsets = [0, 32], sizes = [2, 32], strides = [1, 1]} : vector<2x128xf32> to vector<2x32xf32>
    %243 = vector.extract_strided_slice %240 {offsets = [0, 64], sizes = [2, 32], strides = [1, 1]} : vector<2x128xf32> to vector<2x32xf32>
    %244 = vector.extract_strided_slice %240 {offsets = [0, 96], sizes = [2, 32], strides = [1, 1]} : vector<2x128xf32> to vector<2x32xf32>
    %245 = arith.mulf %242, %230 : vector<2x32xf32>
    %246 = arith.mulf %241, %243 : vector<2x32xf32>
    %247 = arith.addf %245, %246 : vector<2x32xf32>
    %248 = math.tanh %247 : vector<2x32xf32>
    %249 = arith.mulf %244, %248 : vector<2x32xf32>
    %250 = arith.truncf %249 : vector<2x32xf32> to vector<2x32xbf16>
    %251 = vector.extract_strided_slice %178 {offsets = [8, 0], sizes = [2, 128], strides = [1, 1]} : vector<16x128xf32> to vector<2x128xf32>
    %cst_50 = arith.constant dense<0.000000e+00> : vector<2x128xf32>
    %252 = tpu.matmul %250, %174, %cst_50 {dimension_numbers = #tpu.dot_dimension_numbers<[1], [0], [0], [1], [0, 0, 1, 1], [], []>} : vector<2x32xbf16>, vector<32x128xbf16>, vector<2x128xf32> -> vector<2x128xf32>
    %253 = arith.addf %251, %252 : vector<2x128xf32>
    %254 = arith.mulf %253, %11 : vector<2x128xf32>
    %255 = math.tanh %254 : vector<2x128xf32>
    %256 = arith.mulf %255, %11 : vector<2x128xf32>
    %257 = arith.addf %256, %14 : vector<2x128xf32>
    %258 = vector.extract_strided_slice %257 {offsets = [0, 0], sizes = [2, 32], strides = [1, 1]} : vector<2x128xf32> to vector<2x32xf32>
    %259 = vector.extract_strided_slice %257 {offsets = [0, 32], sizes = [2, 32], strides = [1, 1]} : vector<2x128xf32> to vector<2x32xf32>
    %260 = vector.extract_strided_slice %257 {offsets = [0, 64], sizes = [2, 32], strides = [1, 1]} : vector<2x128xf32> to vector<2x32xf32>
    %261 = vector.extract_strided_slice %257 {offsets = [0, 96], sizes = [2, 32], strides = [1, 1]} : vector<2x128xf32> to vector<2x32xf32>
    %262 = arith.mulf %259, %247 : vector<2x32xf32>
    %263 = arith.mulf %258, %260 : vector<2x32xf32>
    %264 = arith.addf %262, %263 : vector<2x32xf32>
    %265 = math.tanh %264 : vector<2x32xf32>
    %266 = arith.mulf %261, %265 : vector<2x32xf32>
    %267 = arith.truncf %266 : vector<2x32xf32> to vector<2x32xbf16>
    %268 = vector.extract_strided_slice %178 {offsets = [10, 0], sizes = [2, 128], strides = [1, 1]} : vector<16x128xf32> to vector<2x128xf32>
    %cst_51 = arith.constant dense<0.000000e+00> : vector<2x128xf32>
    %269 = tpu.matmul %267, %174, %cst_51 {dimension_numbers = #tpu.dot_dimension_numbers<[1], [0], [0], [1], [0, 0, 1, 1], [], []>} : vector<2x32xbf16>, vector<32x128xbf16>, vector<2x128xf32> -> vector<2x128xf32>
    %270 = arith.addf %268, %269 : vector<2x128xf32>
    %271 = arith.mulf %270, %11 : vector<2x128xf32>
    %272 = math.tanh %271 : vector<2x128xf32>
    %273 = arith.mulf %272, %11 : vector<2x128xf32>
    %274 = arith.addf %273, %14 : vector<2x128xf32>
    %275 = vector.extract_strided_slice %274 {offsets = [0, 0], sizes = [2, 32], strides = [1, 1]} : vector<2x128xf32> to vector<2x32xf32>
    %276 = vector.extract_strided_slice %274 {offsets = [0, 32], sizes = [2, 32], strides = [1, 1]} : vector<2x128xf32> to vector<2x32xf32>
    %277 = vector.extract_strided_slice %274 {offsets = [0, 64], sizes = [2, 32], strides = [1, 1]} : vector<2x128xf32> to vector<2x32xf32>
    %278 = vector.extract_strided_slice %274 {offsets = [0, 96], sizes = [2, 32], strides = [1, 1]} : vector<2x128xf32> to vector<2x32xf32>
    %279 = arith.mulf %276, %264 : vector<2x32xf32>
    %280 = arith.mulf %275, %277 : vector<2x32xf32>
    %281 = arith.addf %279, %280 : vector<2x32xf32>
    %282 = math.tanh %281 : vector<2x32xf32>
    %283 = arith.mulf %278, %282 : vector<2x32xf32>
    %284 = arith.truncf %283 : vector<2x32xf32> to vector<2x32xbf16>
    %285 = vector.extract_strided_slice %178 {offsets = [12, 0], sizes = [2, 128], strides = [1, 1]} : vector<16x128xf32> to vector<2x128xf32>
    %cst_52 = arith.constant dense<0.000000e+00> : vector<2x128xf32>
    %286 = tpu.matmul %284, %174, %cst_52 {dimension_numbers = #tpu.dot_dimension_numbers<[1], [0], [0], [1], [0, 0, 1, 1], [], []>} : vector<2x32xbf16>, vector<32x128xbf16>, vector<2x128xf32> -> vector<2x128xf32>
    %287 = arith.addf %285, %286 : vector<2x128xf32>
    %288 = arith.mulf %287, %11 : vector<2x128xf32>
    %289 = math.tanh %288 : vector<2x128xf32>
    %290 = arith.mulf %289, %11 : vector<2x128xf32>
    %291 = arith.addf %290, %14 : vector<2x128xf32>
    %292 = vector.extract_strided_slice %291 {offsets = [0, 0], sizes = [2, 32], strides = [1, 1]} : vector<2x128xf32> to vector<2x32xf32>
    %293 = vector.extract_strided_slice %291 {offsets = [0, 32], sizes = [2, 32], strides = [1, 1]} : vector<2x128xf32> to vector<2x32xf32>
    %294 = vector.extract_strided_slice %291 {offsets = [0, 64], sizes = [2, 32], strides = [1, 1]} : vector<2x128xf32> to vector<2x32xf32>
    %295 = vector.extract_strided_slice %291 {offsets = [0, 96], sizes = [2, 32], strides = [1, 1]} : vector<2x128xf32> to vector<2x32xf32>
    %296 = arith.mulf %293, %281 : vector<2x32xf32>
    %297 = arith.mulf %292, %294 : vector<2x32xf32>
    %298 = arith.addf %296, %297 : vector<2x32xf32>
    %299 = math.tanh %298 : vector<2x32xf32>
    %300 = arith.mulf %295, %299 : vector<2x32xf32>
    %301 = arith.truncf %300 : vector<2x32xf32> to vector<2x32xbf16>
    %302 = vector.extract_strided_slice %178 {offsets = [14, 0], sizes = [2, 128], strides = [1, 1]} : vector<16x128xf32> to vector<2x128xf32>
    %cst_53 = arith.constant dense<0.000000e+00> : vector<2x128xf32>
    %303 = tpu.matmul %301, %174, %cst_53 {dimension_numbers = #tpu.dot_dimension_numbers<[1], [0], [0], [1], [0, 0, 1, 1], [], []>} : vector<2x32xbf16>, vector<32x128xbf16>, vector<2x128xf32> -> vector<2x128xf32>
    %304 = arith.addf %302, %303 : vector<2x128xf32>
    %305 = arith.mulf %304, %11 : vector<2x128xf32>
    %306 = math.tanh %305 : vector<2x128xf32>
    %307 = arith.mulf %306, %11 : vector<2x128xf32>
    %308 = arith.addf %307, %14 : vector<2x128xf32>
    %309 = vector.extract_strided_slice %308 {offsets = [0, 0], sizes = [2, 32], strides = [1, 1]} : vector<2x128xf32> to vector<2x32xf32>
    %310 = vector.extract_strided_slice %308 {offsets = [0, 32], sizes = [2, 32], strides = [1, 1]} : vector<2x128xf32> to vector<2x32xf32>
    %311 = vector.extract_strided_slice %308 {offsets = [0, 64], sizes = [2, 32], strides = [1, 1]} : vector<2x128xf32> to vector<2x32xf32>
    %312 = vector.extract_strided_slice %308 {offsets = [0, 96], sizes = [2, 32], strides = [1, 1]} : vector<2x128xf32> to vector<2x32xf32>
    %313 = arith.mulf %310, %298 : vector<2x32xf32>
    %314 = arith.mulf %309, %311 : vector<2x32xf32>
    %315 = arith.addf %313, %314 : vector<2x32xf32>
    %316 = math.tanh %315 : vector<2x32xf32>
    %317 = arith.mulf %312, %316 : vector<2x32xf32>
    %318 = arith.truncf %317 : vector<2x32xf32> to vector<2x32xbf16>
    %319 = tpu.concatenate %198, %215, %232, %249, %266, %283, %300, %317 in 0 : vector<2x32xf32>, vector<2x32xf32>, vector<2x32xf32>, vector<2x32xf32>, vector<2x32xf32>, vector<2x32xf32>, vector<2x32xf32>, vector<2x32xf32> -> vector<16x32xf32>
    %c1_54 = arith.constant 1 : index
    %c0_55 = arith.constant 0 : index
    %c0_56 = arith.constant 0 : index
    %320 = vector.load %arg11[%c1_54, %c0_55, %c0_56] : memref<2x2x32xbf16, #tpu.memory_space<vmem>>, vector<1x2x32xbf16>
    %321 = vector.shape_cast %320 : vector<1x2x32xbf16> to vector<2x32xbf16>
    %322 = vector.shape_cast %318 : vector<2x32xbf16> to vector<1x2x32xbf16>
    tpu.vector_store %arg11[%c1_54, %c0_55, %c0_56], %322 {strides = array<i32>} : memref<2x2x32xbf16, #tpu.memory_space<vmem>>, vector<1x2x32xbf16>,
    %c1_57 = arith.constant 1 : index
    %c0_58 = arith.constant 0 : index
    %c0_59 = arith.constant 0 : index
    %323 = vector.load %arg12[%c1_57, %c0_58, %c0_59] : memref<2x2x32xf32, #tpu.memory_space<vmem>>, vector<1x2x32xf32>
    %324 = vector.shape_cast %323 : vector<1x2x32xf32> to vector<2x32xf32>
    %325 = vector.shape_cast %315 : vector<2x32xf32> to vector<1x2x32xf32>
    tpu.vector_store %arg12[%c1_57, %c0_58, %c0_59], %325 {strides = array<i32>} : memref<2x2x32xf32, #tpu.memory_space<vmem>>, vector<1x2x32xf32>,
    %c0_i32_60 = arith.constant 0 : i32
    %326 = arith.cmpi eq, %arg0, %c0_i32_60 : i32
    %327 = arith.extui %326 : i1 to i32
    %c0_i32_61 = arith.constant 0 : i32
    %328 = arith.cmpi ne, %327, %c0_i32_61 : i32
    scf.if %328 {
      %c1_64 = arith.constant 1 : index
      %c0_65 = arith.constant 0 : index
      %c0_66 = arith.constant 0 : index
      %330 = vector.load %arg9[%c1_64, %c0_65, %c0_66] : memref<2x2x32xf32, #tpu.memory_space<vmem>>, vector<1x2x32xf32>
      %331 = vector.shape_cast %330 : vector<1x2x32xf32> to vector<2x32xf32>
      %332 = vector.shape_cast %317 : vector<2x32xf32> to vector<1x2x32xf32>
      tpu.vector_store %arg9[%c1_64, %c0_65, %c0_66], %332 {strides = array<i32>} : memref<2x2x32xf32, #tpu.memory_space<vmem>>, vector<1x2x32xf32>,
      %c1_67 = arith.constant 1 : index
      %c0_68 = arith.constant 0 : index
      %c0_69 = arith.constant 0 : index
      %333 = vector.load %arg10[%c1_67, %c0_68, %c0_69] : memref<2x2x32xf32, #tpu.memory_space<vmem>>, vector<1x2x32xf32>
      %334 = vector.shape_cast %333 : vector<1x2x32xf32> to vector<2x32xf32>
      %335 = vector.shape_cast %315 : vector<2x32xf32> to vector<1x2x32xf32>
      tpu.vector_store %arg10[%c1_67, %c0_68, %c0_69], %335 {strides = array<i32>} : memref<2x2x32xf32, #tpu.memory_space<vmem>>, vector<1x2x32xf32>,
    } else {
    }
    %c0_62 = arith.constant 0 : index
    %c0_63 = arith.constant 0 : index
    %329 = vector.load %arg8[%c0_62, %c0_63] : memref<16x32xf32, #tpu.memory_space<vmem>>, vector<16x32xf32>
    tpu.vector_store %arg8[%c0_62, %c0_63], %319 {strides = array<i32>} : memref<16x32xf32, #tpu.memory_space<vmem>>, vector<16x32xf32>,
    return
  }
  func.func @transform_0(%arg0: i32) -> (i32, i32) {
    %c0_i32 = arith.constant 0 : i32
    %c0_i32_0 = arith.constant 0 : i32
    return %arg0, %c0_i32 : i32, i32
  }
  func.func @transform_1(%arg0: i32) -> (i32, i32) {
    %c0_i32 = arith.constant 0 : i32
    %c0_i32_0 = arith.constant 0 : i32
    %c0_i32_1 = arith.constant 0 : i32
    return %c0_i32, %c0_i32_0 : i32, i32
  }
  func.func @transform_2(%arg0: i32) -> (i32, i32) {
    %c0_i32 = arith.constant 0 : i32
    %c0_i32_0 = arith.constant 0 : i32
    %c0_i32_1 = arith.constant 0 : i32
    return %c0_i32, %c0_i32_0 : i32, i32
  }
  func.func @transform_3(%arg0: i32) -> (i32, i32) {
    %c0_i32 = arith.constant 0 : i32
    %c0_i32_0 = arith.constant 0 : i32
    %c0_i32_1 = arith.constant 0 : i32
    return %c0_i32, %c0_i32_0 : i32, i32
  }
  func.func @transform_4(%arg0: i32) -> (i32, i32) {
    %c0_i32 = arith.constant 0 : i32
    %c0_i32_0 = arith.constant 0 : i32
    %c0_i32_1 = arith.constant 0 : i32
    return %c0_i32, %c0_i32_0 : i32, i32
  }
  func.func @transform_5(%arg0: i32) -> (i32, i32) {
    %c0_i32 = arith.constant 0 : i32
    %c0_i32_0 = arith.constant 0 : i32
    %c0_i32_1 = arith.constant 0 : i32
    return %c0_i32, %c0_i32_0 : i32, i32
  }
  func.func @transform_6(%arg0: i32) -> (i32, i32) {
    %c0_i32 = arith.constant 0 : i32
    %c0_i32_0 = arith.constant 0 : i32
    %c0_i32_1 = arith.constant 0 : i32
    return %c0_i32, %c0_i32_0 : i32, i32
  }
  func.func @transform_7(%arg0: i32) -> (i32, i32) {
    %c0_i32 = arith.constant 0 : i32
    %c0_i32_0 = arith.constant 0 : i32
    return %arg0, %c0_i32 : i32, i32
  }
  func.func @transform_8(%arg0: i32) -> (i32, i32, i32) {
    %c0_i32 = arith.constant 0 : i32
    %c0_i32_0 = arith.constant 0 : i32
    %c0_i32_1 = arith.constant 0 : i32
    %c0_i32_2 = arith.constant 0 : i32
    return %c0_i32, %c0_i32_0, %c0_i32_1 : i32, i32, i32
  }
  func.func @transform_9(%arg0: i32) -> (i32, i32, i32) {
    %c0_i32 = arith.constant 0 : i32
    %c0_i32_0 = arith.constant 0 : i32
    %c0_i32_1 = arith.constant 0 : i32
    %c0_i32_2 = arith.constant 0 : i32
    return %c0_i32, %c0_i32_0, %c0_i32_1 : i32, i32, i32
  }
}

</mosaic_0001>

<bundles_post_ra>
// kernel: tpu_custom_call.1
= control target key start
LH: loop header
LB: loop body
LE: loop exit
PB: predicated region body
PF: predicated region fallthrough
CT: control target
= control target key end

     0   :  { %15 = vsyncpa [#allocation5], 0  ;;  %s2595_s0 = inlined_call_operand.hbm [shape: bf16[16,16], index: 0, kind: input, shape index: {}]   ;;  %s2596_s1 = inlined_call_operand.hbm [shape: bf16[16,128], index: 1, kind: input, shape index: {}]   ;;  %s2597_s2 = inlined_call_operand.hbm [shape: bf16[32,128], index: 2, kind: input, shape index: {}]   ;;  %s2598_s3 = inlined_call_operand.vmem [shape: f32[1,128], index: 3, kind: input, shape index: {}]   ;;  %s2599_s4 = inlined_call_operand.hbm [shape: bf16[32,128], index: 4, kind: input, shape index: {}]   ;;  %s2600_s5 = inlined_call_operand.hbm [shape: bf16[32,128], index: 5, kind: input, shape index: {}]   ;;  %s2601_s6 = inlined_call_operand.vmem [shape: f32[1,128], index: 6, kind: input, shape index: {}]   ;;  %s2602_s7 = inlined_call_operand.hbm [shape: f32[16,32], index: 7, kind: output, shape index: {0}]   ;;  %s2603_s8 = inlined_call_operand.hbm [shape: f32[2,2,32], index: 8, kind: output, shape index: {1}]   ;;  %s2604_s9 = inlined_call_operand.hbm [shape: f32[2,2,32], index: 9, kind: output, shape index: {2}]  }
   0x1   :  { %16 = vsyncpa [#allocation8], 0 }
   0x2   :  { %17 = vsyncpa [#allocation11], 0 }
   0x3   :  { %18 = vsyncpa [#allocation6], 0 }
   0x4   :  { %19 = vsyncpa [#allocation15], 0  ;;  %s2126_s30 = smov [#allocation7]   ;;  %s2127_s11 = smov [#allocation10]  }
   0x5   :  { %s37_s10 = sshll.u32 %s2126_s30, 4  ;;  %s63_s12 = sshll.u32 %s2127_s11, 4  ;;  %s38_s10 = int_to_ptr.vmem [resolvable:$true] %s37_s10  ;;  %s64_s12 = int_to_ptr.vmem [resolvable:$true] %s63_s12 }
   0x6   :  { %s1964_s13 = scalar_lea.vmem %s38_s10, 128  ;;  %p1969_p1 = scmp.lt.s32.totalorder %s38_s10, %s38_s10 }
   0x7   :  { %p1965_p0 = scmp.ne.s32.totalorder %s38_s10, %s1964_s13  ;;  %p1970_p2 = scmp.lt.s32.totalorder %s1964_s13, %s1964_s13 }
   0x9   :  { %p1971_p3 = por %p1970_p2, %p1969_p1 }
   0xb   :  { %p1972_p4 = pnand %p1971_p3, %p1965_p0 }
   0xd   :  { %1975 = shalt.err (!%p1972_p4)
}
   0xe   :  { %s2128_s14 = smov 64   ;;  %s2129_s15 = smov 4  }
   0xf   :  { %43 = dma.hbm_to_vmem [thread:$0]  %s2596_s1, 128, %s38_s10, [#allocation8], %s2128_s14, %s2128_s14, %s2129_s15  }
  0x10   :  { %s1984_s18 = scalar_lea.vmem %s64_s12, 256  ;;  %p1989_p6 = scmp.lt.s32.totalorder %s64_s12, %s64_s12 }
  0x11   :  { %p1985_p5 = scmp.ne.s32.totalorder %s64_s12, %s1984_s18  ;;  %p1990_p7 = scmp.lt.s32.totalorder %s1984_s18, %s1984_s18 }
  0x13   :  { %p1991_p8 = por %p1990_p7, %p1989_p6 }
  0x15   :  { %p1992_p9 = pnand %p1991_p8, %p1985_p5 }
  0x17   :  { %1995 = shalt.err (!%p1992_p9)
}
  0x18   :  { %69 = dma.hbm_to_vmem [thread:$0]  %s2599_s4, 256, %s64_s12, [#allocation11], %s2128_s14, %s2128_s14, %s2129_s15  }
  0x19   :  { %s2130_s21 = smov [#allocation4]   ;;  %s2131_s23 = smov [#allocation9]  }
  0x1a   :  { %s25_s22 = sshll.u32 %s2130_s21, 4  ;;  %s49_s24 = sshll.u32 %s2131_s23, 4  ;;  %s26_s22 = int_to_ptr.vmem [resolvable:$true] %s25_s22  ;;  %s50_s24 = int_to_ptr.vmem [resolvable:$true] %s49_s24 }
  0x1b   :  { %s2004_s1 = scalar_lea.vmem %s26_s22, 128  ;;  %p2009_p11 = scmp.lt.s32.totalorder %s26_s22, %s26_s22 }
  0x1c   :  { %p2005_p10 = scmp.ne.s32.totalorder %s26_s22, %s2004_s1  ;;  %p2010_p12 = scmp.lt.s32.totalorder %s2004_s1, %s2004_s1 }
  0x1e   :  { %p2011_p13 = por %p2010_p12, %p2009_p11 }
  0x20   :  { %p2012_p0 = pnand %p2011_p13, %p2005_p10 }
  0x22   :  { %2015 = shalt.err (!%p2012_p0)
}
  0x23   :  { %31 = dma.hbm_to_vmem [thread:$0]  %s2595_s0, 128, %s26_s22, [#allocation5], %s2128_s14, %s2128_s14, %s2129_s15  }
  0x24   :  { %s2024_s4 = scalar_lea.vmem %s50_s24, 256  ;;  %p2029_p2 = scmp.lt.s32.totalorder %s50_s24, %s50_s24 }
  0x25   :  { %p2025_p1 = scmp.ne.s32.totalorder %s50_s24, %s2024_s4  ;;  %p2030_p3 = scmp.lt.s32.totalorder %s2024_s4, %s2024_s4 }
  0x27   :  { %p2031_p4 = por %p2030_p3, %p2029_p2 }
  0x29   :  { %p2032_p5 = pnand %p2031_p4, %p2025_p1 }
  0x2b   :  { %2035 = shalt.err (!%p2032_p5)
}
  0x2c   :  { %55 = dma.hbm_to_vmem [thread:$0]  %s2597_s2, 256, %s50_s24, [#allocation8], %s2128_s14, %s2128_s14, %s2129_s15  }
  0x2d   :  { %s2132_s29 = smov [#allocation12]  }
  0x2e   :  { %s75_s30 = sshll.u32 %s2132_s29, 4  ;;  %s76_s30 = int_to_ptr.vmem [resolvable:$true] %s75_s30 }
  0x2f   :  { %s2044_s10 = scalar_lea.vmem %s76_s30, 256  ;;  %p2049_p7 = scmp.lt.s32.totalorder %s76_s30, %s76_s30 }
  0x30   :  { %p2045_p6 = scmp.ne.s32.totalorder %s76_s30, %s2044_s10  ;;  %p2050_p8 = scmp.lt.s32.totalorder %s2044_s10, %s2044_s10 }
  0x32   :  { %p2051_p9 = por %p2050_p8, %p2049_p7 }
  0x34   :  { %p2052_p10 = pnand %p2051_p9, %p2045_p6 }
  0x36   :  { %2055 = shalt.err (!%p2052_p10)
}
  0x37   :  { %81 = dma.hbm_to_vmem [thread:$0]  %s2600_s5, 256, %s76_s30, [#allocation11], %s2128_s14, %s2128_s14, %s2129_s15  }
  0x38   :  { %2116 = dma.done.wait [#allocation5], 128  }
  0x39   :  { %2117 = vsyncadd [#allocation5], 4294967168 }
  0x3a   :  { %2118 = dma.done.wait [#allocation8], 384  }
  0x3b   :  { %2119 = vsyncadd [#allocation8], 4294966912 }
  0x3c   :  { %2120 = dma.done.wait [#allocation11], 512  }
  0x3d   :  { %2121 = vsyncadd [#allocation11], 4294966784  ;;  %vm104_vm0 = vcmask 253952   ;;  %v2133_v0 = vmov 0.0   ;;  %vm2134_vm1 = vmmov 0   ;;  %v2135_v1 = vmov 0  }
  0x3e   :  { %1722 = vmatprep.subr.bf16.mxu0 %v2133_v0  ;;  %1728 = vmatprep.subr.bf16.mxu1 %v2133_v0  ;;  %105 = vst.msk [vmem:[#allocation2] sm:$0x1] %vm104_vm0, %v2135_v1  ;;  %106 = vst.msk [vmem:[#allocation2 + $0x1] sm:$0x1] %vm104_vm0, %v2135_v1  ;;  %v1884_v2 = vld [vmem:[#allocation7] sm:$0xff]   ;;  %v2234_v3 = vld [vmem:[#allocation9 + $0x8] sm:$0xff]   ;;  %v114_v7 = vlaneseq }
  0x3f   :  { %1724 = vmatprep.mubr.msk.bf16.mxu0 %vm2134_vm1, %v2133_v0  ;;  %1732 = vmatprep.mubr.msk.bf16.mxu1 %vm2134_vm1, %v2133_v0  ;;  %v1886_v4 = vld [vmem:[#allocation4] sm:$0xff]   ;;  %vm147_vm2 = vcmask 130048   ;;  %v2237_v5 = vld [vmem:[#allocation9] sm:$0xff]   ;;  %vm206_vm3 = vcmask 261120   ;;  %vm107_vm4 = vcmask 254976   ;;  %v2136_v15 = vmov 0.5  }
  0x40   :  { %1723 = vmatpush3.bf16.msra.mxu0 %v1884_v2  ;;  %1729 = vmatpush3.bf16.msra.mxu1 %v2234_v3  ;;  %108 = vst.msk [vmem:[#allocation3] sm:$0x3] %vm107_vm4, %v2133_v0  ;;  %109 = vst.msk [vmem:[#allocation3 + $0x2] sm:$0x3] %vm107_vm4, %v2133_v0  ;;  %v115_v8 = vand.u32 127, %v114_v7  ;;  %vm804_vm8 = vcmask 1041408  }
  0x41   :  { %1736 = vmatprep.subr.bf16.mxu0 %v2133_v0  ;;  %1730 = vmatprep.subr.bf16.mxu1 %v2133_v0  ;;  %110 = vst.msk [vmem:[#allocation14] sm:$0x3] %vm107_vm4, %v2133_v0  ;;  %111 = vst.msk [vmem:[#allocation14 + $0x2] sm:$0x3] %vm107_vm4, %v2133_v0  ;;  %v1641_v9 = vld [vmem:[%s2598_s3] ss:$0 sm:$0xff] }
  0x42   :  { %112 = vst.msk [vmem:[#allocation16] sm:$0x3] %vm107_vm4, %v2133_v0  ;;  %113 = vst.msk [vmem:[#allocation16 + $0x2] sm:$0x3] %vm107_vm4, %v2133_v0  ;;  %vm116_vm5 = vcmp.ge.s32.totalorder %v115_v8, 64  ;;  %vm117_vm6 = vcmp.lt.s32.totalorder %v115_v8, 96 }
  0x43   :  { %1725 = vmatmul.mubr.msk.bf16.vlgmr.msra.gmra.mxu0 %vm147_vm2, %v1886_v4  ;;  %vm118_vm7 = vmand %vm116_vm5, %vm117_vm6  ;;  %s2137_s3 = smov 32   ;;  %vm806_vm9 = vcmask 1043456   ;;  %vm808_vm10 = vcmask 1045504   ;;  %vm839_vm11 = vcmask 261126   ;;  %s2141_s16 = smov [#allocation13]  }
  0x44   :  { %1737 = vmatpush3.bf16.msra.mxu0 %v2234_v3  ;;  %1740 = vmatprep.mubr.msk.bf16.mxu0 %vm2134_vm1, %v2133_v0  ;;  %v2270_v16 = vsel %vm118_vm7, 1.0, %v2136_v15  ;;  %v2274_v25 = vsel %vm118_vm7, 0.0, %v2136_v15  ;;  %s1596_s17 = sshll.u32 %s2141_s16, 4  ;;  %s2142_s18 = smov [#allocation16]   ;;  %s2572_s17 = int_to_ptr.vmem [resolvable:$true] %s1596_s17 }
  0x45   :  { %1731 = vmatpush3.bf16.msra.mxu1 %v2237_v5  ;;  %v192_v6 = vld [vmem:[#allocation2] sm:$0x1]  ;;  %1738 = vmatprep.subr.bf16.mxu0 %v2133_v0  ;;  %s1620_s19 = sshll.u32 %s2142_s18, 4  ;;  %s1621_s19 = int_to_ptr.vmem [resolvable:$true] %s1620_s19 }
  0x46   :  { %1744 = vmatprep.subr.bf16.mxu1 %v2133_v0 }
  0x47   :  { %v193_v28 = vld [vmem:[#allocation3] sm:$0x3] }
  0x48   :  { %1733 = vmatmul.mubr.msk.bf16.vlgmr.msra.gmra.mxu1 %vm206_vm3, %v192_v6  ;;  %1739 = vmatpush3.bf16.msra.mxu0 %v2237_v5 }
  0x49   :  { %1745 = vmatpush3.bf16.msra.mxu1 %v2234_v3  ;;  %1748 = vmatprep.mubr.msk.bf16.mxu1 %vm2134_vm1, %v2133_v0 }
  0x4a   :  { %1746 = vmatprep.subr.bf16.mxu1 %v2133_v0  ;;  %1752 = vmatprep.subr.bf16.mxu0 %v2133_v0 }
  0x4d   :  { %1747 = vmatpush3.bf16.msra.mxu1 %v2237_v5 }
  0x4e   :  { %1760 = vmatprep.subr.bf16.mxu1 %v2133_v0 }
 0x103   :  { %v185_v10 = vpop.f32.mrf.mxu0 }
 0x104   :  { %v2266_v11 = vadd.f32 %v1641_v9, %v185_v10 }
 0x105   :  { %v1726_v12 = vpop.f32.mrf.mxu0 }
 0x107   :  { %v188_v13 = vpop.f32.mrf.mxu0 }
 0x108   :  { %v2268_v14 = vadd.f32 %v1641_v9, %v188_v13  ;;  %v244_v17 = vpop.f32.mrf.mxu1 }
 0x109   :  { %v250_v18 = vadd.f32 %v244_v17, %v2266_v11  ;;  %v1727_v19 = vpop.f32.mrf.mxu0 }
 0x10a   :  { %v1734_v20 = vpop.f32.mrf.mxu1 }
 0x10b   :  { %v251_v21 = vmul.f32 %v250_v18, %v2270_v16 }
 0x10c   :  { %v247_v22 = vpop.f32.mrf.mxu1 }
 0x10d   :  { %1892 = vtanh.f32 %v251_v21 }
 0x10e   :  { %v1735_v23 = vpop.f32.mrf.mxu1 }
 0x11a   :  { %v1893_v24 = vpop.eup %1892 }
 0x11b   :  { %v253_v26 = vmul.f32 %v1893_v24, %v2270_v16 }
 0x11d   :  { %v254_v27 = vadd.f32 %v253_v26, %v2274_v25 }
 0x11f   :  { %261 = vrot.lane.b32.xlu0 %v254_v27, %s2128_s14 }
 0x123   :  { %256 = vrot.lane.b32.xlu0 %v193_v28, %s2137_s3 }
 0x191   :  { %v262_v29 = vpop.permute.xlu0 %261 }
 0x192   :  { %v264_v30 = vmul.f32 %v262_v29, %v254_v27 }
 0x194   :  { %266 = vrot.lane.b32.xlu1 %v264_v30, %s2137_s3 }
 0x195   :  { %v257_v31 = vpop.permute.xlu0 %256 }
 0x196   :  { %v259_v32 = vmul.f32 %v257_v31, %v254_v27 }
 0x206   :  { %v267_v33 = vpop.permute.xlu1 %266 }
 0x207   :  { %v269_v34 = vadd.f32 %v267_v33, %v259_v32 }
 0x209   :  { %1894 = vtanh.f32 %v269_v34  ;;  %v332_v52 = vrot.slane %v269_v34, 6 }
 0x216   :  { %v1895_v35 = vpop.eup %1894 }
 0x217   :  { %272 = vrot.lane.b32.xlu1 %v1895_v35, %s2128_s14 }
 0x289   :  { %v273_v36 = vpop.permute.xlu1 %272 }
 0x28a   :  { %v2282_v37 = vmul.f32 %v273_v36, %v254_v27 }
 0x28c   :  { %v276_v38 = vpack.c.bf16 %v2282_v37, %v2282_v37 }
 0x28e   :  { %278 = vrot.lane.b32.xlu0 %v276_v38, %s2137_s3 }
 0x300   :  { %v279_v39 = vpop.permute.xlu0 %278 }
 0x301   :  { %1741 = vmatmul.mubr.msk.bf16.vlgmr.msra.gmra.mxu0 %vm206_vm3, %v279_v39 }
 0x302   :  { %1753 = vmatpush3.bf16.msra.mxu0 %v2234_v3  ;;  %1756 = vmatprep.mubr.msk.bf16.mxu0 %vm2134_vm1, %v2133_v0 }
 0x303   :  { %1754 = vmatprep.subr.bf16.mxu0 %v2133_v0 }
 0x306   :  { %1755 = vmatpush3.bf16.msra.mxu0 %v2237_v5 }
 0x307   :  { %1768 = vmatprep.subr.bf16.mxu0 %v2133_v0 }
 0x3c1   :  { %v317_v40 = vpop.f32.mrf.mxu0 }
 0x3c2   :  { %v324_v41 = vrot.slane %v317_v40, 6 }
 0x3c3   :  { %v1742_v42 = vpop.f32.mrf.mxu0 }
 0x3c4   :  { %v326_v43 = vadd.f32 %v324_v41, %v2266_v11 }
 0x3c5   :  { %v320_v44 = vpop.f32.mrf.mxu0 }
 0x3c6   :  { %v327_v45 = vmul.f32 %v326_v43, %v2270_v16 }
 0x3c7   :  { %v1743_v46 = vpop.f32.mrf.mxu0 }
 0x3c8   :  { %1896 = vtanh.f32 %v327_v45 }
 0x3d5   :  { %v1897_v47 = vpop.eup %1896 }
 0x3d6   :  { %v329_v48 = vmul.f32 %v1897_v47, %v2270_v16 }
 0x3d8   :  { %v330_v49 = vadd.f32 %v329_v48, %v2274_v25 }
 0x3da   :  { %336 = vrot.lane.b32.xlu1 %v330_v49, %s2128_s14  ;;  %v334_v53 = vmul.f32 %v332_v52, %v330_v49 }
 0x44c   :  { %v337_v50 = vpop.permute.xlu1 %336 }
 0x44d   :  { %v339_v51 = vmul.f32 %v337_v50, %v330_v49 }
 0x44f   :  { %341 = vrot.lane.b32.xlu0 %v339_v51, %s2137_s3 }
 0x4c1   :  { %v342_v54 = vpop.permute.xlu0 %341 }
 0x4c2   :  { %v344_v55 = vadd.f32 %v342_v54, %v334_v53 }
 0x4c4   :  { %1898 = vtanh.f32 %v344_v55  ;;  %v408_v17 = vrot.slane %v344_v55, 6 }
 0x4d1   :  { %v1899_v56 = vpop.eup %1898 }
 0x4d2   :  { %347 = vrot.lane.b32.xlu1 %v1899_v56, %s2128_s14 }
 0x544   :  { %v348_v57 = vpop.permute.xlu1 %347 }
 0x545   :  { %v350_v58 = vmul.f32 %v348_v57, %v330_v49 }
 0x547   :  { %v351_v59 = vpack.c.bf16 %v350_v58, %v350_v58  ;;  %v805_v24 = vsel %vm804_vm8, %v2282_v37, %v350_v58 }
 0x549   :  { %v353_v60 = vrot.slane %v351_v59, 1 }
 0x54b   :  { %354 = vrot.lane.b32.xlu0 %v353_v60, %s2137_s3 }
 0x5bd   :  { %v355_v61 = vpop.permute.xlu0 %354 }
 0x5be   :  { %1749 = vmatmul.mubr.msk.bf16.vlgmr.msra.gmra.mxu1 %vm206_vm3, %v355_v61 }
 0x5bf   :  { %1761 = vmatpush3.bf16.msra.mxu1 %v2234_v3  ;;  %1764 = vmatprep.mubr.msk.bf16.mxu1 %vm2134_vm1, %v2133_v0 }
 0x5c0   :  { %1762 = vmatprep.subr.bf16.mxu1 %v2133_v0 }
 0x5c3   :  { %1763 = vmatpush3.bf16.msra.mxu1 %v2237_v5 }
 0x5c4   :  { %1776 = vmatprep.subr.bf16.mxu1 %v2133_v0 }
 0x67e   :  { %v393_v62 = vpop.f32.mrf.mxu1 }
 0x67f   :  { %v400_v63 = vrot.slane %v393_v62, 4 }
 0x680   :  { %v1750_v1 = vpop.f32.mrf.mxu1 }
 0x681   :  { %v402_v2 = vadd.f32 %v400_v63, %v2266_v11 }
 0x682   :  { %v396_v4 = vpop.f32.mrf.mxu1 }
 0x683   :  { %v403_v6 = vmul.f32 %v402_v2, %v2270_v16 }
 0x684   :  { %v1751_v8 = vpop.f32.mrf.mxu1 }
 0x685   :  { %1900 = vtanh.f32 %v403_v6 }
 0x692   :  { %v1901_v9 = vpop.eup %1900 }
 0x693   :  { %v405_v10 = vmul.f32 %v1901_v9, %v2270_v16 }
 0x695   :  { %v406_v12 = vadd.f32 %v405_v10, %v2274_v25 }
 0x697   :  { %412 = vrot.lane.b32.xlu1 %v406_v12, %s2128_s14  ;;  %v410_v18 = vmul.f32 %v408_v17, %v406_v12 }
 0x709   :  { %v413_v13 = vpop.permute.xlu1 %412 }
 0x70a   :  { %v415_v15 = vmul.f32 %v413_v13, %v406_v12 }
 0x70c   :  { %417 = vrot.lane.b32.xlu0 %v415_v15, %s2137_s3 }
 0x77e   :  { %v418_v19 = vpop.permute.xlu0 %417 }
 0x77f   :  { %v420_v20 = vadd.f32 %v418_v19, %v410_v18 }
 0x781   :  { %1902 = vtanh.f32 %v420_v20  ;;  %v484_v42 = vrot.slane %v420_v20, 6 }
 0x78e   :  { %v1903_v21 = vpop.eup %1902 }
 0x78f   :  { %423 = vrot.lane.b32.xlu1 %v1903_v21, %s2128_s14 }
 0x801   :  { %v424_v22 = vpop.permute.xlu1 %423 }
 0x802   :  { %v426_v23 = vmul.f32 %v424_v22, %v406_v12 }
 0x804   :  { %v427_v26 = vpack.c.bf16 %v426_v23, %v426_v23  ;;  %v807_v27 = vsel %vm806_vm9, %v805_v24, %v426_v23 }
 0x806   :  { %v429_v28 = vrot.slane %v427_v26, 2 }
 0x808   :  { %430 = vrot.lane.b32.xlu0 %v429_v28, %s2137_s3 }
 0x87a   :  { %v431_v29 = vpop.permute.xlu0 %430 }
 0x87b   :  { %1757 = vmatmul.mubr.msk.bf16.vlgmr.msra.gmra.mxu0 %vm206_vm3, %v431_v29 }
 0x87c   :  { %1769 = vmatpush3.bf16.msra.mxu0 %v2234_v3  ;;  %1772 = vmatprep.mubr.msk.bf16.mxu0 %vm2134_vm1, %v2133_v0 }
 0x87d   :  { %1770 = vmatprep.subr.bf16.mxu0 %v2133_v0 }
 0x880   :  { %1771 = vmatpush3.bf16.msra.mxu0 %v2237_v5 }
 0x881   :  { %1784 = vmatprep.subr.bf16.mxu0 %v2133_v0 }
 0x93b   :  { %v469_v30 = vpop.f32.mrf.mxu0 }
 0x93c   :  { %v476_v31 = vrot.slane %v469_v30, 2 }
 0x93d   :  { %v1758_v32 = vpop.f32.mrf.mxu0 }
 0x93e   :  { %v478_v33 = vadd.f32 %v476_v31, %v2266_v11 }
 0x93f   :  { %v472_v34 = vpop.f32.mrf.mxu0 }
 0x940   :  { %v479_v35 = vmul.f32 %v478_v33, %v2270_v16 }
 0x941   :  { %v1759_v36 = vpop.f32.mrf.mxu0 }
 0x942   :  { %1904 = vtanh.f32 %v479_v35 }
 0x94f   :  { %v1905_v37 = vpop.eup %1904 }
 0x950   :  { %v481_v38 = vmul.f32 %v1905_v37, %v2270_v16 }
 0x952   :  { %v482_v39 = vadd.f32 %v481_v38, %v2274_v25 }
 0x954   :  { %488 = vrot.lane.b32.xlu1 %v482_v39, %s2128_s14  ;;  %v486_v43 = vmul.f32 %v484_v42, %v482_v39 }
 0x9c6   :  { %v489_v40 = vpop.permute.xlu1 %488 }
 0x9c7   :  { %v491_v41 = vmul.f32 %v489_v40, %v482_v39 }
 0x9c9   :  { %493 = vrot.lane.b32.xlu0 %v491_v41, %s2137_s3 }
 0xa3b   :  { %v494_v44 = vpop.permute.xlu0 %493 }
 0xa3c   :  { %v496_v11 = vadd.f32 %v494_v44, %v486_v43 }
 0xa3e   :  { %1906 = vtanh.f32 %v496_v11  ;;  %v557_v63 = vrot.slane %v496_v11, 6 }
 0xa4b   :  { %v1907_v45 = vpop.eup %1906 }
 0xa4c   :  { %499 = vrot.lane.b32.xlu1 %v1907_v45, %s2128_s14 }
 0xabe   :  { %v500_v46 = vpop.permute.xlu1 %499 }
 0xabf   :  { %v502_v47 = vmul.f32 %v500_v46, %v482_v39 }
 0xac1   :  { %v503_v48 = vpack.c.bf16 %v502_v47, %v502_v47  ;;  %v2335_v49 = vsel %vm808_vm10, %v807_v27, %v502_v47 }
 0xac3   :  { %v505_v50 = vrot.slane %v503_v48, 3 }
 0xac5   :  { %506 = vrot.lane.b32.xlu0 %v505_v50, %s2137_s3 }
 0xb37   :  { %v507_v51 = vpop.permute.xlu0 %506 }
 0xb38   :  { %1765 = vmatmul.mubr.msk.bf16.vlgmr.msra.gmra.mxu1 %vm206_vm3, %v507_v51 }
 0xb39   :  { %1777 = vmatpush3.bf16.msra.mxu1 %v2234_v3  ;;  %1780 = vmatprep.mubr.msk.bf16.mxu1 %vm2134_vm1, %v2133_v0 }
 0xb3a   :  { %1778 = vmatprep.subr.bf16.mxu1 %v2133_v0 }
 0xb3d   :  { %1779 = vmatpush3.bf16.msra.mxu1 %v2237_v5 }
 0xb3e   :  { %1792 = vmatprep.subr.bf16.mxu1 %v2133_v0 }
 0xbf8   :  { %v545_v52 = vpop.f32.mrf.mxu1 }
 0xbf9   :  { %v551_v53 = vadd.f32 %v545_v52, %v2268_v14 }
 0xbfa   :  { %v1766_v54 = vpop.f32.mrf.mxu1 }
 0xbfb   :  { %v552_v55 = vmul.f32 %v551_v53, %v2270_v16 }
 0xbfc   :  { %v548_v56 = vpop.f32.mrf.mxu1 }
 0xbfd   :  { %1908 = vtanh.f32 %v552_v55 }
 0xbfe   :  { %v1767_v57 = vpop.f32.mrf.mxu1 }
 0xc0a   :  { %v1909_v58 = vpop.eup %1908 }
 0xc0b   :  { %v554_v59 = vmul.f32 %v1909_v58, %v2270_v16 }
 0xc0d   :  { %v555_v60 = vadd.f32 %v554_v59, %v2274_v25 }
 0xc0f   :  { %561 = vrot.lane.b32.xlu1 %v555_v60, %s2128_s14  ;;  %v559_v1 = vmul.f32 %v557_v63, %v555_v60 }
 0xc81   :  { %v562_v61 = vpop.permute.xlu1 %561 }
 0xc82   :  { %v564_v62 = vmul.f32 %v562_v61, %v555_v60 }
 0xc84   :  { %566 = vrot.lane.b32.xlu0 %v564_v62, %s2137_s3 }
 0xcf6   :  { %v567_v2 = vpop.permute.xlu0 %566 }
 0xcf7   :  { %v569_v4 = vadd.f32 %v567_v2, %v559_v1 }
 0xcf9   :  { %1910 = vtanh.f32 %v569_v4  ;;  %v632_v26 = vrot.slane %v569_v4, 6 }
 0xd06   :  { %v1911_v6 = vpop.eup %1910 }
 0xd07   :  { %572 = vrot.lane.b32.xlu1 %v1911_v6, %s2128_s14 }
 0xd79   :  { %v573_v8 = vpop.permute.xlu1 %572 }
 0xd7a   :  { %v2352_v9 = vmul.f32 %v573_v8, %v555_v60 }
 0xd7c   :  { %v576_v10 = vpack.c.bf16 %v2352_v9, %v2352_v9 }
 0xd7e   :  { %578 = vrot.lane.b32.xlu0 %v576_v10, %s2137_s3 }
 0xdf0   :  { %v579_v12 = vpop.permute.xlu0 %578 }
 0xdf1   :  { %1773 = vmatmul.mubr.msk.bf16.vlgmr.msra.gmra.mxu0 %vm206_vm3, %v579_v12 }
 0xdf2   :  { %1785 = vmatpush3.bf16.msra.mxu0 %v2234_v3  ;;  %1788 = vmatprep.mubr.msk.bf16.mxu0 %vm2134_vm1, %v2133_v0 }
 0xdf3   :  { %1786 = vmatprep.subr.bf16.mxu0 %v2133_v0 }
 0xdf6   :  { %1787 = vmatpush3.bf16.msra.mxu0 %v2237_v5 }
 0xdf7   :  { %1800 = vmatprep.subr.bf16.mxu0 %v2133_v0 }
 0xeb1   :  { %v617_v13 = vpop.f32.mrf.mxu0 }
 0xeb2   :  { %v624_v15 = vrot.slane %v617_v13, 6 }
 0xeb3   :  { %v1774_v17 = vpop.f32.mrf.mxu0 }
 0xeb4   :  { %v626_v18 = vadd.f32 %v624_v15, %v2268_v14 }
 0xeb5   :  { %v620_v19 = vpop.f32.mrf.mxu0 }
 0xeb6   :  { %v627_v20 = vmul.f32 %v626_v18, %v2270_v16  ;;  %v2398_v18 = vld [vmem:[#allocation12 + $0x8] sm:$0xff]   ;;  %v1889_v19 = vld [vmem:[#allocation10 + $0x8] sm:$0xff]  }
 0xeb7   :  { %v1775_v21 = vpop.f32.mrf.mxu0 }
 0xeb8   :  { %1912 = vtanh.f32 %v627_v20  ;;  %v2401_v20 = vld [vmem:[#allocation12] sm:$0xff]   ;;  %v1891_v21 = vld [vmem:[#allocation10] sm:$0xff]  }
 0xec5   :  { %v1913_v3 = vpop.eup %1912 }
 0xec6   :  { %v629_v22 = vmul.f32 %v1913_v3, %v2270_v16  ;;  %v926_v3 = vld [vmem:[#allocation2 + $0x1] sm:$0x1] }
 0xec8   :  { %v630_v23 = vadd.f32 %v629_v22, %v2274_v25 }
 0xeca   :  { %636 = vrot.lane.b32.xlu1 %v630_v23, %s2128_s14  ;;  %v634_v27 = vmul.f32 %v632_v26, %v630_v23 }
 0xf3c   :  { %v637_v5 = vpop.permute.xlu1 %636 }
 0xf3d   :  { %v639_v24 = vmul.f32 %v637_v5, %v630_v23 }
 0xf3f   :  { %641 = vrot.lane.b32.xlu0 %v639_v24, %s2137_s3 }
 0xfb1   :  { %v642_v28 = vpop.permute.xlu0 %641 }
 0xfb2   :  { %v644_v29 = vadd.f32 %v642_v28, %v634_v27  ;;  %v928_v27 = vld [vmem:[#allocation3 + $0x2] sm:$0x3] }
 0xfb4   :  { %1914 = vtanh.f32 %v644_v29  ;;  %v708_v47 = vrot.slane %v644_v29, 6 }
 0xfc1   :  { %v1915_v30 = vpop.eup %1914 }
 0xfc2   :  { %647 = vrot.lane.b32.xlu1 %v1915_v30, %s2128_s14 }
0x1034   :  { %v648_v31 = vpop.permute.xlu1 %647 }
0x1035   :  { %v650_v32 = vmul.f32 %v648_v31, %v630_v23 }
0x1037   :  { %v651_v33 = vpack.c.bf16 %v650_v32, %v650_v32  ;;  %v810_v55 = vsel %vm804_vm8, %v2352_v9, %v650_v32 }
0x1039   :  { %v653_v34 = vrot.slane %v651_v33, 1 }
0x103b   :  { %654 = vrot.lane.b32.xlu0 %v653_v34, %s2137_s3 }
0x10ad   :  { %v655_v35 = vpop.permute.xlu0 %654 }
0x10ae   :  { %1781 = vmatmul.mubr.msk.bf16.vlgmr.msra.gmra.mxu1 %vm206_vm3, %v655_v35 }
0x10af   :  { %1796 = vmatprep.mubr.msk.bf16.mxu1 %vm2134_vm1, %v2133_v0  ;;  %1793 = vmatpush3.bf16.msra.mxu1 %v1889_v19 }
0x10b0   :  { %1794 = vmatprep.subr.bf16.mxu1 %v2133_v0 }
0x10b3   :  { %1795 = vmatpush3.bf16.msra.mxu1 %v1891_v21 }
0x10b4   :  { %1808 = vmatprep.subr.bf16.mxu1 %v2133_v0 }
0x116e   :  { %v693_v36 = vpop.f32.mrf.mxu1 }
0x116f   :  { %v700_v37 = vrot.slane %v693_v36, 4 }
0x1170   :  { %v1782_v38 = vpop.f32.mrf.mxu1 }
0x1171   :  { %v702_v39 = vadd.f32 %v700_v37, %v2268_v14 }
0x1172   :  { %v696_v40 = vpop.f32.mrf.mxu1 }
0x1173   :  { %v703_v41 = vmul.f32 %v702_v39, %v2270_v16 }
0x1174   :  { %v1783_v42 = vpop.f32.mrf.mxu1 }
0x1175   :  { %1916 = vtanh.f32 %v703_v41 }
0x1182   :  { %v1917_v43 = vpop.eup %1916 }
0x1183   :  { %v705_v44 = vmul.f32 %v1917_v43, %v2270_v16 }
0x1185   :  { %v706_v11 = vadd.f32 %v705_v44, %v2274_v25 }
0x1187   :  { %712 = vrot.lane.b32.xlu1 %v706_v11, %s2128_s14  ;;  %v710_v48 = vmul.f32 %v708_v47, %v706_v11 }
0x11f9   :  { %v713_v45 = vpop.permute.xlu1 %712 }
0x11fa   :  { %v715_v46 = vmul.f32 %v713_v45, %v706_v11 }
0x11fc   :  { %717 = vrot.lane.b32.xlu0 %v715_v46, %s2137_s3 }
0x126e   :  { %v718_v50 = vpop.permute.xlu0 %717 }
0x126f   :  { %v720_v51 = vadd.f32 %v718_v50, %v710_v48 }
0x1271   :  { %1918 = vtanh.f32 %v720_v51  ;;  %v784_v13 = vrot.slane %v720_v51, 6 }
0x127e   :  { %v1919_v52 = vpop.eup %1918 }
0x127f   :  { %723 = vrot.lane.b32.xlu1 %v1919_v52, %s2128_s14 }
0x12f1   :  { %v724_v53 = vpop.permute.xlu1 %723 }
0x12f2   :  { %v726_v54 = vmul.f32 %v724_v53, %v706_v11 }
0x12f4   :  { %v727_v56 = vpack.c.bf16 %v726_v54, %v726_v54  ;;  %v811_v57 = vsel %vm806_vm9, %v810_v55, %v726_v54 }
0x12f6   :  { %v729_v58 = vrot.slane %v727_v56, 2 }
0x12f8   :  { %730 = vrot.lane.b32.xlu0 %v729_v58, %s2137_s3 }
0x136a   :  { %v731_v59 = vpop.permute.xlu0 %730 }
0x136b   :  { %1789 = vmatmul.mubr.msk.bf16.vlgmr.msra.gmra.mxu0 %vm206_vm3, %v731_v59 }
0x136c   :  { %1804 = vmatprep.mubr.msk.bf16.mxu0 %vm2134_vm1, %v2133_v0  ;;  %1801 = vmatpush3.bf16.msra.mxu0 %v2398_v18 }
0x136d   :  { %1802 = vmatprep.subr.bf16.mxu0 %v2133_v0 }
0x1370   :  { %1803 = vmatpush3.bf16.msra.mxu0 %v2401_v20 }
0x1371   :  { %1816 = vmatprep.subr.bf16.mxu0 %v2133_v0 }
0x1373   :  { %1805 = vmatmul.mubr.msk.bf16.vlgmr.msra.gmra.mxu0 %vm206_vm3, %v926_v3 }
0x1374   :  { %1817 = vmatpush3.bf16.msra.mxu0 %v2398_v18  ;;  %1820 = vmatprep.mubr.msk.bf16.mxu0 %vm2134_vm1, %v2133_v0 }
0x1375   :  { %1818 = vmatprep.subr.bf16.mxu0 %v2133_v0 }
0x1378   :  { %1819 = vmatpush3.bf16.msra.mxu0 %v2401_v20 }
0x1379   :  { %1832 = vmatprep.subr.bf16.mxu0 %v2133_v0 }
0x142b   :  { %v769_v60 = vpop.f32.mrf.mxu0 }
0x142c   :  { %v776_v61 = vrot.slane %v769_v60, 2 }
0x142d   :  { %v1790_v62 = vpop.f32.mrf.mxu0 }
0x142e   :  { %v778_v63 = vadd.f32 %v776_v61, %v2268_v14 }
0x142f   :  { %v772_v1 = vpop.f32.mrf.mxu0 }
0x1430   :  { %v779_v2 = vmul.f32 %v778_v63, %v2270_v16 }
0x1431   :  { %v1791_v4 = vpop.f32.mrf.mxu0 }
0x1432   :  { %1920 = vtanh.f32 %v779_v2 }
0x1433   :  { %v978_v28 = vpop.f32.mrf.mxu0 }
0x1435   :  { %v1806_v29 = vpop.f32.mrf.mxu0 }
0x1437   :  { %v981_v30 = vpop.f32.mrf.mxu0 }
0x1439   :  { %v1807_v31 = vpop.f32.mrf.mxu0 }
0x143f   :  { %v1921_v6 = vpop.eup %1920 }
0x1440   :  { %v781_v8 = vmul.f32 %v1921_v6, %v2270_v16 }
0x1442   :  { %v782_v9 = vadd.f32 %v781_v8, %v2274_v25 }
0x1444   :  { %788 = vrot.lane.b32.xlu1 %v782_v9, %s2128_s14  ;;  %v786_v15 = vmul.f32 %v784_v13, %v782_v9 }
0x14b6   :  { %v789_v10 = vpop.permute.xlu1 %788 }
0x14b7   :  { %v791_v12 = vmul.f32 %v789_v10, %v782_v9 }
0x14b9   :  { %793 = vrot.lane.b32.xlu0 %v791_v12, %s2137_s3 }
0x152b   :  { %v794_v17 = vpop.permute.xlu0 %793 }
0x152c   :  { %v2395_v14 = vadd.f32 %v794_v17, %v786_v15 }
0x152e   :  { %1922 = vtanh.f32 %v2395_v14 }
0x153b   :  { %v1923_v22 = vpop.eup %1922 }
0x153c   :  { %799 = vrot.lane.b32.xlu1 %v1923_v22, %s2128_s14 }
0x15ae   :  { %v800_v23 = vpop.permute.xlu1 %799 }
0x15af   :  { %v2416_v5 = vmul.f32 %v800_v23, %v782_v9 }
0x15b1   :  { %v812_v24 = vsel %vm808_vm10, %v811_v57, %v2416_v5 }
0x15b2   :  { %v850_v26 = vpack.c.bf16 %v812_v24, %v2335_v49  ;;  %v1655_v49 = vld [vmem:[%s2601_s6] ss:$0 sm:$0xff]  ;;  %s2139_s6 = smov 96  }
0x15b4   :  { %867 = vrot.lane.b32.xlu0 %v850_v26, %s2137_s3 }
0x15b8   :  { %990 = vrot.lane.b32.xlu0 %v928_v27, %s2137_s3 }
0x1626   :  { %v868_v32 = vpop.permute.xlu0 %867 }
0x1627   :  { %1797 = vmatmul.mubr.msk.bf16.vlgmr.msra.gmra.mxu1 %vm206_vm3, %v868_v32 }
0x1628   :  { %1809 = vmatpush3.bf16.msra.mxu1 %v2398_v18  ;;  %1812 = vmatprep.mubr.msk.bf16.mxu1 %vm2134_vm1, %v2133_v0 }
0x1629   :  { %1810 = vmatprep.subr.bf16.mxu1 %v2133_v0 }
0x162a   :  { %v991_v45 = vpop.permute.xlu0 %990 }
0x162c   :  { %1811 = vmatpush3.bf16.msra.mxu1 %v2401_v20 }
0x162d   :  { %1824 = vmatprep.subr.bf16.mxu1 %v2133_v0 }
0x16e7   :  { %v918_v33 = vpop.f32.mrf.mxu1 }
0x16e8   :  { %v2433_v34 = vadd.f32 %v1655_v49, %v918_v33 }
0x16e9   :  { %v1798_v35 = vpop.f32.mrf.mxu1 }
0x16ea   :  { %v984_v36 = vadd.f32 %v978_v28, %v2433_v34 }
0x16eb   :  { %v921_v37 = vpop.f32.mrf.mxu1 }
0x16ec   :  { %v985_v38 = vmul.f32 %v984_v36, %v2270_v16  ;;  %v2437_v39 = vadd.f32 %v1655_v49, %v921_v37 }
0x16ed   :  { %v1799_v40 = vpop.f32.mrf.mxu1 }
0x16ee   :  { %1924 = vtanh.f32 %v985_v38 }
0x16fb   :  { %v1925_v41 = vpop.eup %1924 }
0x16fc   :  { %v987_v42 = vmul.f32 %v1925_v41, %v2270_v16 }
0x16fe   :  { %v988_v43 = vadd.f32 %v987_v42, %v2274_v25 }
0x1700   :  { %995 = vrot.lane.b32.xlu1 %v988_v43, %s2128_s14  ;;  %v993_v46 = vmul.f32 %v991_v45, %v988_v43 }
0x1772   :  { %v996_v44 = vpop.permute.xlu1 %995 }
0x1773   :  { %v998_v11 = vmul.f32 %v996_v44, %v988_v43 }
0x1775   :  { %1000 = vrot.lane.b32.xlu1 %v998_v11, %s2137_s3 }
0x17e7   :  { %v1001_v47 = vpop.permute.xlu1 %1000 }
0x17e8   :  { %v1003_v48 = vadd.f32 %v1001_v47, %v993_v46 }
0x17ea   :  { %1926 = vtanh.f32 %v1003_v48  ;;  %v1066_v6 = vrot.slane %v1003_v48, 6 }
0x17f7   :  { %v1927_v50 = vpop.eup %1926 }
0x17f8   :  { %1006 = vrot.lane.b32.xlu0 %v1927_v50, %s2128_s14 }
0x186a   :  { %v1007_v51 = vpop.permute.xlu0 %1006 }
0x186b   :  { %v2444_v52 = vmul.f32 %v1007_v51, %v988_v43 }
0x186d   :  { %v1010_v53 = vpack.c.bf16 %v2444_v52, %v2444_v52 }
0x186f   :  { %1012 = vrot.lane.b32.xlu1 %v1010_v53, %s2137_s3 }
0x18e1   :  { %v1013_v54 = vpop.permute.xlu1 %1012 }
0x18e2   :  { %1813 = vmatmul.mubr.msk.bf16.vlgmr.msra.gmra.mxu1 %vm206_vm3, %v1013_v54 }
0x18e3   :  { %1825 = vmatpush3.bf16.msra.mxu1 %v2398_v18  ;;  %1828 = vmatprep.mubr.msk.bf16.mxu1 %vm2134_vm1, %v2133_v0 }
0x18e4   :  { %1826 = vmatprep.subr.bf16.mxu1 %v2133_v0 }
0x18e7   :  { %1827 = vmatpush3.bf16.msra.mxu1 %v2401_v20 }
0x18e8   :  { %1840 = vmatprep.subr.bf16.mxu1 %v2133_v0 }
0x19a2   :  { %v1051_v55 = vpop.f32.mrf.mxu1 }
0x19a3   :  { %v1058_v56 = vrot.slane %v1051_v55, 6 }
0x19a4   :  { %v1814_v57 = vpop.f32.mrf.mxu1 }
0x19a5   :  { %v1060_v58 = vadd.f32 %v1058_v56, %v2433_v34 }
0x19a6   :  { %v1054_v59 = vpop.f32.mrf.mxu1 }
0x19a7   :  { %v1061_v60 = vmul.f32 %v1060_v58, %v2270_v16 }
0x19a8   :  { %v1815_v61 = vpop.f32.mrf.mxu1 }
0x19a9   :  { %1928 = vtanh.f32 %v1061_v60 }
0x19b6   :  { %v1929_v62 = vpop.eup %1928 }
0x19b7   :  { %v1063_v63 = vmul.f32 %v1929_v62, %v2270_v16 }
0x19b9   :  { %v1064_v1 = vadd.f32 %v1063_v63, %v2274_v25 }
0x19bb   :  { %1070 = vrot.lane.b32.xlu0 %v1064_v1, %s2128_s14  ;;  %v1068_v8 = vmul.f32 %v1066_v6, %v1064_v1 }
0x1a2d   :  { %v1071_v2 = vpop.permute.xlu0 %1070 }
0x1a2e   :  { %v1073_v4 = vmul.f32 %v1071_v2, %v1064_v1 }
0x1a30   :  { %1075 = vrot.lane.b32.xlu1 %v1073_v4, %s2137_s3 }
0x1aa2   :  { %v1076_v9 = vpop.permute.xlu1 %1075 }
0x1aa3   :  { %v1078_v10 = vadd.f32 %v1076_v9, %v1068_v8 }
0x1aa5   :  { %1930 = vtanh.f32 %v1078_v10  ;;  %v1142_v33 = vrot.slane %v1078_v10, 6 }
0x1ab2   :  { %v1931_v12 = vpop.eup %1930 }
0x1ab3   :  { %1081 = vrot.lane.b32.xlu0 %v1931_v12, %s2128_s14 }
0x1b25   :  { %v1082_v13 = vpop.permute.xlu0 %1081 }
0x1b26   :  { %v1084_v15 = vmul.f32 %v1082_v13, %v1064_v1 }
0x1b28   :  { %v1085_v17 = vpack.c.bf16 %v1084_v15, %v1084_v15  ;;  %v1538_v42 = vsel %vm804_vm8, %v2444_v52, %v1084_v15 }
0x1b2a   :  { %v1087_v19 = vrot.slane %v1085_v17, 1 }
0x1b2c   :  { %1088 = vrot.lane.b32.xlu1 %v1087_v19, %s2137_s3 }
0x1b9e   :  { %v1089_v21 = vpop.permute.xlu1 %1088 }
0x1b9f   :  { %1821 = vmatmul.mubr.msk.bf16.vlgmr.msra.gmra.mxu0 %vm206_vm3, %v1089_v21 }
0x1ba0   :  { %1833 = vmatpush3.bf16.msra.mxu0 %v2398_v18  ;;  %1836 = vmatprep.mubr.msk.bf16.mxu0 %vm2134_vm1, %v2133_v0 }
0x1ba1   :  { %1834 = vmatprep.subr.bf16.mxu0 %v2133_v0 }
0x1ba4   :  { %1835 = vmatpush3.bf16.msra.mxu0 %v2401_v20 }
0x1ba5   :  { %1848 = vmatprep.subr.bf16.mxu0 %v2133_v0 }
0x1c5f   :  { %v1127_v3 = vpop.f32.mrf.mxu0 }
0x1c60   :  { %v1134_v22 = vrot.slane %v1127_v3, 4 }
0x1c61   :  { %v1822_v23 = vpop.f32.mrf.mxu0 }
0x1c62   :  { %v1136_v24 = vadd.f32 %v1134_v22, %v2433_v34 }
0x1c63   :  { %v1130_v26 = vpop.f32.mrf.mxu0 }
0x1c64   :  { %v1137_v27 = vmul.f32 %v1136_v24, %v2270_v16 }
0x1c65   :  { %v1823_v28 = vpop.f32.mrf.mxu0 }
0x1c66   :  { %1932 = vtanh.f32 %v1137_v27 }
0x1c73   :  { %v1933_v29 = vpop.eup %1932 }
0x1c74   :  { %v1139_v30 = vmul.f32 %v1933_v29, %v2270_v16 }
0x1c76   :  { %v1140_v31 = vadd.f32 %v1139_v30, %v2274_v25 }
0x1c78   :  { %1146 = vrot.lane.b32.xlu0 %v1140_v31, %s2128_s14  ;;  %v1144_v35 = vmul.f32 %v1142_v33, %v1140_v31 }
0x1cea   :  { %v1147_v32 = vpop.permute.xlu0 %1146 }
0x1ceb   :  { %v1149_v49 = vmul.f32 %v1147_v32, %v1140_v31 }
0x1ced   :  { %1151 = vrot.lane.b32.xlu1 %v1149_v49, %s2137_s3 }
0x1d5f   :  { %v1152_v36 = vpop.permute.xlu1 %1151 }
0x1d60   :  { %v1154_v37 = vadd.f32 %v1152_v36, %v1144_v35 }
0x1d62   :  { %1934 = vtanh.f32 %v1154_v37  ;;  %v1218_v59 = vrot.slane %v1154_v37, 6 }
0x1d6f   :  { %v1935_v38 = vpop.eup %1934 }
0x1d70   :  { %1157 = vrot.lane.b32.xlu0 %v1935_v38, %s2128_s14 }
0x1de2   :  { %v1158_v40 = vpop.permute.xlu0 %1157 }
0x1de3   :  { %v1160_v41 = vmul.f32 %v1158_v40, %v1140_v31 }
0x1de5   :  { %v1161_v43 = vpack.c.bf16 %v1160_v41, %v1160_v41  ;;  %v1539_v44 = vsel %vm806_vm9, %v1538_v42, %v1160_v41 }
0x1de7   :  { %v1163_v11 = vrot.slane %v1161_v43, 2 }
0x1de9   :  { %1164 = vrot.lane.b32.xlu1 %v1163_v11, %s2137_s3 }
0x1e5b   :  { %v1165_v45 = vpop.permute.xlu1 %1164 }
0x1e5c   :  { %1829 = vmatmul.mubr.msk.bf16.vlgmr.msra.gmra.mxu1 %vm206_vm3, %v1165_v45 }
0x1e5d   :  { %1841 = vmatpush3.bf16.msra.mxu1 %v2398_v18  ;;  %1844 = vmatprep.mubr.msk.bf16.mxu1 %vm2134_vm1, %v2133_v0 }
0x1e5e   :  { %1842 = vmatprep.subr.bf16.mxu1 %v2133_v0 }
0x1e61   :  { %1843 = vmatpush3.bf16.msra.mxu1 %v2401_v20 }
0x1e62   :  { %1856 = vmatprep.subr.bf16.mxu1 %v2133_v0 }
0x1f1c   :  { %v1203_v46 = vpop.f32.mrf.mxu1 }
0x1f1d   :  { %v1210_v47 = vrot.slane %v1203_v46, 2 }
0x1f1e   :  { %v1830_v48 = vpop.f32.mrf.mxu1 }
0x1f1f   :  { %v1212_v50 = vadd.f32 %v1210_v47, %v2433_v34 }
0x1f20   :  { %v1206_v51 = vpop.f32.mrf.mxu1 }
0x1f21   :  { %v1213_v52 = vmul.f32 %v1212_v50, %v2270_v16 }
0x1f22   :  { %v1831_v53 = vpop.f32.mrf.mxu1 }
0x1f23   :  { %1936 = vtanh.f32 %v1213_v52 }
0x1f30   :  { %v1937_v54 = vpop.eup %1936 }
0x1f31   :  { %v1215_v55 = vmul.f32 %v1937_v54, %v2270_v16 }
0x1f33   :  { %v1216_v56 = vadd.f32 %v1215_v55, %v2274_v25 }
0x1f35   :  { %1222 = vrot.lane.b32.xlu0 %v1216_v56, %s2128_s14  ;;  %v1220_v60 = vmul.f32 %v1218_v59, %v1216_v56 }
0x1fa7   :  { %v1223_v57 = vpop.permute.xlu0 %1222 }
0x1fa8   :  { %v1225_v58 = vmul.f32 %v1223_v57, %v1216_v56 }
0x1faa   :  { %1227 = vrot.lane.b32.xlu1 %v1225_v58, %s2137_s3 }
0x201c   :  { %v1228_v61 = vpop.permute.xlu1 %1227 }
0x201d   :  { %v1230_v34 = vadd.f32 %v1228_v61, %v1220_v60 }
0x201f   :  { %1938 = vtanh.f32 %v1230_v34  ;;  %v1291_v24 = vrot.slane %v1230_v34, 6 }
0x202c   :  { %v1939_v62 = vpop.eup %1938 }
0x202d   :  { %1233 = vrot.lane.b32.xlu0 %v1939_v62, %s2128_s14 }
0x209f   :  { %v1234_v63 = vpop.permute.xlu0 %1233 }
0x20a0   :  { %v1236_v1 = vmul.f32 %v1234_v63, %v1216_v56 }
0x20a2   :  { %v1237_v2 = vpack.c.bf16 %v1236_v1, %v1236_v1  ;;  %v2497_v4 = vsel %vm808_vm10, %v1539_v44, %v1236_v1 }
0x20a4   :  { %v1239_v6 = vrot.slane %v1237_v2, 3 }
0x20a6   :  { %1240 = vrot.lane.b32.xlu1 %v1239_v6, %s2137_s3 }
0x2118   :  { %v1241_v8 = vpop.permute.xlu1 %1240 }
0x2119   :  { %1837 = vmatmul.mubr.msk.bf16.vlgmr.msra.gmra.mxu0 %vm206_vm3, %v1241_v8 }
0x211a   :  { %1849 = vmatpush3.bf16.msra.mxu0 %v2398_v18  ;;  %1852 = vmatprep.mubr.msk.bf16.mxu0 %vm2134_vm1, %v2133_v0 }
0x211b   :  { %1850 = vmatprep.subr.bf16.mxu0 %v2133_v0 }
0x211e   :  { %1851 = vmatpush3.bf16.msra.mxu0 %v2401_v20 }
0x21d9   :  { %v1279_v9 = vpop.f32.mrf.mxu0 }
0x21da   :  { %v1285_v10 = vadd.f32 %v1279_v9, %v2437_v39 }
0x21db   :  { %v1838_v12 = vpop.f32.mrf.mxu0 }
0x21dc   :  { %v1286_v13 = vmul.f32 %v1285_v10, %v2270_v16 }
0x21dd   :  { %v1282_v15 = vpop.f32.mrf.mxu0 }
0x21de   :  { %1940 = vtanh.f32 %v1286_v13 }
0x21df   :  { %v1839_v17 = vpop.f32.mrf.mxu0 }
0x21eb   :  { %v1941_v19 = vpop.eup %1940 }
0x21ec   :  { %v1288_v21 = vmul.f32 %v1941_v19, %v2270_v16 }
0x21ee   :  { %v1289_v3 = vadd.f32 %v1288_v21, %v2274_v25 }
0x21f0   :  { %1295 = vrot.lane.b32.xlu0 %v1289_v3, %s2128_s14  ;;  %v1293_v26 = vmul.f32 %v1291_v24, %v1289_v3 }
0x2262   :  { %v1296_v22 = vpop.permute.xlu0 %1295 }
0x2263   :  { %v1298_v23 = vmul.f32 %v1296_v22, %v1289_v3 }
0x2265   :  { %1300 = vrot.lane.b32.xlu1 %v1298_v23, %s2137_s3 }
0x22d7   :  { %v1301_v27 = vpop.permute.xlu1 %1300 }
0x22d8   :  { %v1303_v28 = vadd.f32 %v1301_v27, %v1293_v26 }
0x22da   :  { %1942 = vtanh.f32 %v1303_v28 }
0x22e7   :  { %v1943_v29 = vpop.eup %1942 }
0x22e8   :  { %1306 = vrot.lane.b32.xlu0 %v1943_v29, %s2128_s14 }
0x235a   :  { %v1307_v30 = vpop.permute.xlu0 %1306 }
0x235b   :  { %v2513_v31 = vmul.f32 %v1307_v30, %v1289_v3 }
0x235d   :  { %v1310_v32 = vpack.c.bf16 %v2513_v31, %v2513_v31 }
0x235f   :  { %1312 = vrot.lane.b32.xlu1 %v1310_v32, %s2137_s3 }
0x23d1   :  { %v1313_v49 = vpop.permute.xlu1 %1312 }
0x23d2   :  { %1845 = vmatmul.mubr.msk.bf16.vlgmr.msra.gmra.mxu1 %vm206_vm3, %v1313_v49  ;;  %v2138_v49 = vmov 1966171168  }
0x23d3   :  { %1857 = vmatpush3.bf16.msra.mxu1 %v2398_v18  ;;  %1860 = vmatprep.mubr.msk.bf16.mxu1 %vm2134_vm1, %v2133_v0 }
0x23d4   :  { %1858 = vmatprep.subr.bf16.mxu1 %v2133_v0 }
0x23d7   :  { %1859 = vmatpush3.bf16.msra.mxu1 %v2401_v20  ;;  %v1366_v20 = vrot.slane %v1303_v28, 6 }
0x2492   :  { %v1351_v33 = vpop.f32.mrf.mxu1 }
0x2493   :  { %v1358_v35 = vrot.slane %v1351_v33, 6  ;;  %v815_v33 = vunpack.c.l.s4 %v2138_v49 }
0x2494   :  { %v1846_v36 = vpop.f32.mrf.mxu1 }
0x2495   :  { %v1360_v37 = vadd.f32 %v1358_v35, %v2437_v39  ;;  %v816_v35 = vunpack.c.0.s8 %v815_v33  ;;  %v818_v36 = vshrl.u32 %v114_v7, 7 }
0x2496   :  { %v1354_v38 = vpop.f32.mrf.mxu1 }
0x2497   :  { %v1361_v40 = vmul.f32 %v1360_v37, %v2270_v16 }
0x2498   :  { %v1847_v41 = vpop.f32.mrf.mxu1 }
0x2499   :  { %1944 = vtanh.f32 %v1361_v40  ;;  %v819_v40 = vsub.s32 %v816_v35, %v818_v36 }
0x24a6   :  { %v1945_v42 = vpop.eup %1944 }
0x24a7   :  { %v1363_v18 = vmul.f32 %v1945_v42, %v2270_v16 }
0x24a9   :  { %v1364_v43 = vadd.f32 %v1363_v18, %v2274_v25 }
0x24ab   :  { %1370 = vrot.lane.b32.xlu0 %v1364_v43, %s2128_s14  ;;  %v1368_v11 = vmul.f32 %v1366_v20, %v1364_v43 }
0x251d   :  { %v1371_v0 = vpop.permute.xlu0 %1370 }
0x251e   :  { %v1373_v44 = vmul.f32 %v1371_v0, %v1364_v43 }
0x2520   :  { %1375 = vrot.lane.b32.xlu1 %v1373_v44, %s2137_s3 }
0x2592   :  { %v1376_v45 = vpop.permute.xlu1 %1375 }
0x2593   :  { %v1378_v46 = vadd.f32 %v1376_v45, %v1368_v11 }
0x2595   :  { %1946 = vtanh.f32 %v1378_v46  ;;  %v1442_v2 = vrot.slane %v1378_v46, 6 }
0x25a2   :  { %v1947_v47 = vpop.eup %1946 }
0x25a3   :  { %1381 = vrot.lane.b32.xlu0 %v1947_v47, %s2128_s14 }
0x2615   :  { %v1382_v48 = vpop.permute.xlu0 %1381 }
0x2616   :  { %v1384_v50 = vmul.f32 %v1382_v48, %v1364_v43 }
0x2618   :  { %v1385_v51 = vpack.c.bf16 %v1384_v50, %v1384_v50  ;;  %v1541_v15 = vsel %vm804_vm8, %v2513_v31, %v1384_v50 }
0x261a   :  { %v1387_v52 = vrot.slane %v1385_v51, 1 }
0x261c   :  { %1388 = vrot.lane.b32.xlu1 %v1387_v52, %s2137_s3 }
0x268e   :  { %v1389_v53 = vpop.permute.xlu1 %1388 }
0x268f   :  { %1853 = vmatmul.mubr.msk.bf16.vlgmr.msra.gmra.mxu0 %vm206_vm3, %v1389_v53 }
0x274f   :  { %v1427_v54 = vpop.f32.mrf.mxu0 }
0x2750   :  { %v1434_v55 = vrot.slane %v1427_v54, 4 }
0x2751   :  { %v1854_v56 = vpop.f32.mrf.mxu0 }
0x2752   :  { %v1436_v57 = vadd.f32 %v1434_v55, %v2437_v39 }
0x2753   :  { %v1430_v58 = vpop.f32.mrf.mxu0 }
0x2754   :  { %v1437_v59 = vmul.f32 %v1436_v57, %v2270_v16 }
0x2755   :  { %v1855_v60 = vpop.f32.mrf.mxu0 }
0x2756   :  { %1948 = vtanh.f32 %v1437_v59 }
0x2763   :  { %v1949_v61 = vpop.eup %1948 }
0x2764   :  { %v1439_v34 = vmul.f32 %v1949_v61, %v2270_v16 }
0x2766   :  { %v1440_v62 = vadd.f32 %v1439_v34, %v2274_v25 }
0x2768   :  { %1446 = vrot.lane.b32.xlu0 %v1440_v62, %s2128_s14  ;;  %v1444_v6 = vmul.f32 %v1442_v2, %v1440_v62 }
0x27da   :  { %v1447_v63 = vpop.permute.xlu0 %1446 }
0x27db   :  { %v1449_v1 = vmul.f32 %v1447_v63, %v1440_v62 }
0x27dd   :  { %1451 = vrot.lane.b32.xlu1 %v1449_v1, %s2137_s3 }
0x284f   :  { %v1452_v8 = vpop.permute.xlu1 %1451 }
0x2850   :  { %v1454_v9 = vadd.f32 %v1452_v8, %v1444_v6 }
0x2852   :  { %1950 = vtanh.f32 %v1454_v9  ;;  %v1518_v42 = vrot.slane %v1454_v9, 6 }
0x285f   :  { %v1951_v10 = vpop.eup %1950 }
0x2860   :  { %1457 = vrot.lane.b32.xlu0 %v1951_v10, %s2128_s14 }
0x28d2   :  { %v1458_v12 = vpop.permute.xlu0 %1457 }
0x28d3   :  { %v1460_v13 = vmul.f32 %v1458_v12, %v1440_v62 }
0x28d5   :  { %v1461_v17 = vpack.c.bf16 %v1460_v13, %v1460_v13  ;;  %v1542_v19 = vsel %vm806_vm9, %v1541_v15, %v1460_v13 }
0x28d7   :  { %v1463_v21 = vrot.slane %v1461_v17, 2 }
0x28d9   :  { %1464 = vrot.lane.b32.xlu1 %v1463_v21, %s2137_s3 }
0x294b   :  { %v1465_v3 = vpop.permute.xlu1 %1464 }
0x294c   :  { %1861 = vmatmul.mubr.msk.bf16.vlgmr.msra.gmra.mxu1 %vm206_vm3, %v1465_v3 }
0x2a0c   :  { %v1503_v22 = vpop.f32.mrf.mxu1 }
0x2a0d   :  { %v1510_v23 = vrot.slane %v1503_v22, 2 }
0x2a0e   :  { %v1862_v24 = vpop.f32.mrf.mxu1 }
0x2a0f   :  { %v1512_v26 = vadd.f32 %v1510_v23, %v2437_v39  ;;  %v803_v39 = vpack.c.bf16 %v2416_v5, %v2416_v5 }
0x2a10   :  { %v1506_v27 = vpop.f32.mrf.mxu1 }
0x2a11   :  { %v1513_v28 = vmul.f32 %v1512_v26, %v2270_v16  ;;  %v820_v41 = vrot.slane %v803_v39, %v819_v40 }
0x2a12   :  { %v1863_v29 = vpop.f32.mrf.mxu1 }
0x2a13   :  { %1952 = vtanh.f32 %v1513_v28 }
0x2a20   :  { %v1953_v30 = vpop.eup %1952 }
0x2a21   :  { %v1515_v31 = vmul.f32 %v1953_v30, %v2270_v16  ;;  %v821_v16 = vcombine.high %v820_v41, %v820_v41 }
0x2a23   :  { %v1516_v32 = vadd.f32 %v1515_v31, %v2274_v25  ;;  %v828_v25 = vrot.slane %v821_v16, %v819_v40 }
0x2a25   :  { %1522 = vrot.lane.b32.xlu0 %v1516_v32, %s2128_s14  ;;  %v829_v7 = vcombine.high %v828_v25, %v828_v25  ;;  %v1520_v18 = vmul.f32 %v1518_v42, %v1516_v32 }
0x2a97   :  { %v1523_v37 = vpop.permute.xlu0 %1522 }
0x2a98   :  { %v1525_v38 = vmul.f32 %v1523_v37, %v1516_v32 }
0x2a9a   :  { %1527 = vrot.lane.b32.xlu1 %v1525_v38, %s2137_s3 }
0x2a9e   :  { %845 = vrot.lane.b32.xlu1 %v2416_v5, %s2137_s3 }
0x2aa2   :  { %836 = vrot.lane.b32.xlu1 %v2395_v14, %s2139_s6 }
0x2aa6   :  { %1583 = vrot.lane.b32.xlu1 %v2497_v4, %s2137_s3 }
0x2aaa   :  { %830 = vrot.lane.b32.xlu1 %v829_v7, %s2137_s3 }
0x2b0c   :  { %v1528_v43 = vpop.permute.xlu1 %1527 }
0x2b0d   :  { %v1530_v0 = vadd.f32 %v1528_v43, %v1520_v18 }
0x2b0f   :  { %1954 = vtanh.f32 %v1530_v0 }
0x2b10   :  { %v846_v44 = vpop.permute.xlu1 %845 }
0x2b11   :  { %848 = vst.msk [vmem:[#allocation14 - $0x6] sm:$0xc0] %vm839_vm11, %v846_v44 }
0x2b14   :  { %v837_v5 = vpop.permute.xlu1 %836 }
0x2b15   :  { %840 = vst.msk [vmem:[#allocation3 - $0x6] sm:$0xc0] %vm839_vm11, %v837_v5  ;;  %849 = vst.msk [vmem:[#allocation16 - $0x6] sm:$0xc0] %vm839_vm11, %v837_v5 }
0x2b18   :  { %v1584_v14 = vpop.permute.xlu1 %1583 }
0x2b19   :  { %1589 = vst.msk [vmem:[#allocation13] sm:$0xff] %vm206_vm3, %v1584_v14 }
0x2b1c   :  { %v1955_v4 = vpop.eup %1954  ;;  %v831_v20 = vpop.permute.xlu1 %830 }
0x2b1d   :  { %834 = vst.msk [vmem:[#allocation2] sm:$0x1] %vm104_vm0, %v831_v20  ;;  %1533 = vrot.lane.b32.xlu0 %v1955_v4, %s2128_s14  ;;  %s2140_s14 = smov [#allocation14]  }
0x2b1e   :  { %s1608_s15 = sshll.u32 %s2140_s14, 4  ;;  %s1609_s15 = int_to_ptr.vmem [resolvable:$true] %s1608_s15 }
0x2b1f   :  { %s2056_s20 = scalar_lea.vmem %s1609_s15, 64  ;;  %p2061_p12 = scmp.lt.s32.totalorder %s1609_s15, %s1609_s15 }
0x2b20   :  { %p2057_p11 = scmp.ne.s32.totalorder %s1609_s15, %s2056_s20  ;;  %p2062_p13 = scmp.lt.s32.totalorder %s2056_s20, %s2056_s20 }
0x2b21   :  { %1566 = vrot.lane.b32.xlu0 %v1530_v0, %s2139_s6 }
0x2b22   :  { %p2063_p0 = por %p2062_p13, %p2061_p12 }
0x2b24   :  { %p2064_p1 = pnand %p2063_p0, %p2057_p11 }
0x2b8f   :  { %v1534_v11 = vpop.permute.xlu0 %1533 }
0x2b90   :  { %v1536_v45 = vmul.f32 %v1534_v11, %v1516_v32 }
0x2b92   :  { %v1537_v46 = vpack.c.bf16 %v1536_v45, %v1536_v45  ;;  %1574 = vrot.lane.b32.xlu0 %v1536_v45, %s2137_s3  ;;  %v1543_v50 = vsel %vm808_vm10, %v1542_v19, %v1536_v45 }
0x2b93   :  { %v1567_v47 = vpop.permute.xlu0 %1566 }
0x2b94   :  { %1569 = vst.msk [vmem:[#allocation3 - $0x4] sm:$0xc0] %vm839_vm11, %v1567_v47  ;;  %1580 = vst.msk [vmem:[#allocation16 - $0x4] sm:$0xc0] %vm839_vm11, %v1567_v47  ;;  %v1551_v48 = vrot.slane %v1537_v46, %v819_v40 }
0x2b96   :  { %1585 = vrot.lane.b32.xlu0 %v1543_v50, %s2137_s3  ;;  %v1552_v51 = vcombine.high %v1551_v48, %v1551_v48 }
0x2b98   :  { %v1559_v52 = vrot.slane %v1552_v51, %v819_v40 }
0x2b9a   :  { %v1560_v53 = vcombine.high %v1559_v52, %v1559_v52 }
0x2b9c   :  { %1561 = vrot.lane.b32.xlu0 %v1560_v53, %s2137_s3 }
0x2c04   :  { %v1575_v54 = vpop.permute.xlu0 %1574 }
0x2c05   :  { %1578 = vst.msk [vmem:[#allocation14 - $0x4] sm:$0xc0] %vm839_vm11, %v1575_v54 }
0x2c06   :  { %2067 = shalt.err (!%p2064_p1)
}
0x2c07   :  { %s2143_s21 = smov 2   ;;  %s2076_s24 = scalar_lea.vmem %s1621_s19, 64 }
0x2c08   :  { %1614 = dma.vmem_to_hbm [thread:$0]  %s1609_s15, 64, %s2603_s8, [#allocation15], %s2137_s3, %s2137_s3, %s2143_s21  }
0x2c09   :  { %p2077_p2 = scmp.ne.s32.totalorder %s1621_s19, %s2076_s24  ;;  %p2081_p3 = scmp.lt.s32.totalorder %s1621_s19, %s1621_s19 }
0x2c0a   :  { %p2082_p4 = scmp.lt.s32.totalorder %s2076_s24, %s2076_s24 }
0x2c0c   :  { %p2083_p5 = por %p2082_p4, %p2081_p3 }
0x2c0e   :  { %p2084_p6 = pnand %p2083_p5, %p2077_p2 }
0x2c10   :  { %2087 = shalt.err (!%p2084_p6)
}
0x2c11   :  { %1626 = dma.vmem_to_hbm [thread:$0]  %s1621_s19, 64, %s2604_s9, [#allocation15], %s2137_s3, %s2137_s3, %s2143_s21   ;;  %v1586_v55 = vpop.permute.xlu0 %1585 }
0x2c12   :  { %1590 = vst.msk [vmem:[#allocation13 + $0x8] sm:$0xff] %vm206_vm3, %v1586_v55  ;;  %s2096_s8 = scalar_lea.vmem %s2572_s17, 256  ;;  %p2101_p8 = scmp.lt.s32.totalorder %s2572_s17, %s2572_s17 }
0x2c13   :  { %p2097_p7 = scmp.ne.s32.totalorder %s2572_s17, %s2096_s8  ;;  %p2102_p9 = scmp.lt.s32.totalorder %s2096_s8, %s2096_s8 }
0x2c15   :  { %p2103_p10 = por %p2102_p9, %p2101_p8 }
0x2c17   :  { %p2104_p11 = pnand %p2103_p10, %p2097_p7 }
0x2c19   :  { %2107 = shalt.err (!%p2104_p11)
}
0x2c1a   :  { %s2144_s26 = smov 128   ;;  %s2145_s4 = smov 8   ;;  %v1562_v56 = vpop.permute.xlu0 %1561 }
0x2c1b   :  { %1602 = dma.vmem_to_hbm [thread:$0]  %s2572_s17, 256, %s2602_s7, [#allocation6], %s2144_s26, %s2144_s26, %s2145_s4   ;;  %1564 = vst.msk [vmem:[#allocation2 + $0x1] sm:$0x1] %vm104_vm0, %v1562_v56 }
0x2c1c   :  { %2122 = dma.done.wait [#allocation6], 256  }
0x2c1d   :  { %2123 = vsyncadd [#allocation6], 4294967040 }
0x2c1e   :  { %2124 = dma.done.wait [#allocation15], 128  }
0x2c1f   :  { %2125 = vsyncadd [#allocation15], 4294967168 }
0x2c20   :  { %1636 = vsyncpa [#allocation5], 1 }
0x2c21   :  { %1637 = vsyncpa [#allocation8], 1 }
0x2c22   :  { %1638 = vsyncpa [#allocation11], 1 }
0x2c23   :  { %1639 = vsyncpa [#allocation6], 1 }
0x2c24   :  { %1640 = vsyncpa [#allocation15], 1 }

</bundles_post_ra>
